<compile_context>
chip_gen: v7x
topology: tpu7x:2x2x1
jax: 0.10.0
libtpu: 0.0.40
codegen_flags: <defaults>
</compile_context>

<pallas_src>
import jax
import jax.numpy as jnp
from jax.experimental import pallas as pl
from jax.experimental.pallas import tpu as pltpu


def _sigmoid_exp(x):
    # Reference-only exact sigmoid (independent of the kernel's tanh form).
    return 1.0 / (1.0 + jnp.exp(-x))


# ----------------------------------------------------------------------------
# Pallas kernel: full LSTMNet forward (seq + future autoregression + Linear).
# ----------------------------------------------------------------------------
def _make_lstm_net_kernel(T, B, H, num_layers, future):
    n_w = 3 * num_layers

    def kernel(*refs):
        x_ref = refs[0]                                  # (T*B, 4)  t-major, b-minor
        layer_refs = refs[1:1 + n_w]
        wlin_ref = refs[1 + n_w]                         # (H, 4)
        blin_ref = refs[2 + n_w]                         # (1, 4)
        out_ref = refs[3 + n_w]                          # ((T+future)*B, 4)
        h_buf = refs[4 + n_w]                            # VMEM scratch (T*B, H)

        # Weights loaded once (~16 vregs total incl. state -> no spill pressure;
        # if shapes grow, index the refs inside the loop instead: 3 vld slots/cycle).
        w_ih = [layer_refs[3 * l + 0][...] for l in range(num_layers)]   # (in_l, 4H)
        w_hh = [layer_refs[3 * l + 1][...] for l in range(num_layers)]   # (H,   4H)
        bias = [layer_refs[3 * l + 2][...] for l in range(num_layers)]   # (1,   4H)
        w_lin = wlin_ref[...]
        b_lin = blin_ref[...]

        # (1) Hoisted layer-0 input projection: one batched matmul for all T steps.
        xg0 = jnp.dot(x_ref[...], w_ih[0],
                      preferred_element_type=jnp.float32)                # (T*B, 4H)

        h = [jnp.zeros((B, H), jnp.float32) for _ in range(num_layers)]
        c = [jnp.zeros((B, H), jnp.float32) for _ in range(num_layers)]

        def gates_to_hc(gates, c_prev):
            # (4) sigmoid(x) = 0.5*tanh(0.5*x)+0.5 : two full-vreg EUP tanh passes,
            # no exp / exact divide on the serialized recurrence.
            sig = 0.5 * jnp.tanh(0.5 * gates) + 0.5
            tnh = jnp.tanh(gates)
            i_g = sig[:, 0 * H:1 * H]
            f_g = sig[:, 1 * H:2 * H]
            g_g = tnh[:, 2 * H:3 * H]
            o_g = sig[:, 3 * H:4 * H]
            c_new = f_g * c_prev + i_g * g_g
            h_new = o_g * jnp.tanh(c_new)
            return h_new, c_new

        def stack_step(x_gate0, h, c):
            """One multi-layer LSTM step. x_gate0: (B, 4H) = x_t @ W_ih[0]."""
            h, c = list(h), list(c)
            inp_gate = x_gate0
            for l in range(num_layers):
                gates = (inp_gate
                         + jnp.dot(h[l], w_hh[l], preferred_element_type=jnp.float32)
                         + bias[l])                                      # (B, 4H)
                h[l], c[l] = gates_to_hc(gates, c[l])
                if l + 1 < num_layers:
                    inp_gate = jnp.dot(h[l], w_ih[l + 1],
                                       preferred_element_type=jnp.float32)
            return h, c

        # In-sequence recurrence (T is small & static -> fully unrolled).
        for t in range(T):
            h, c = stack_step(xg0[t * B:(t + 1) * B, :], h, c)
            # (2) park top-layer h_t off-chain; Linear applied once afterwards.
            h_buf[pl.ds(t * B, B), :] = h[num_layers - 1]

        # (2)+(3) single batched Linear + one slab store for the in-sequence outputs.
        y_seq = (jnp.dot(h_buf[...], w_lin, preferred_element_type=jnp.float32)
                 + b_lin)                                                # (T*B, 4)
        out_ref[pl.ds(0, T * B), :] = y_seq

        if future > 0:
            # PyTorch quirk kept on purpose: the future loop is seeded with
            # output[-2:-1] (the SECOND-to-last in-sequence output), not the last.
            last = y_seq[(T - 2) * B:(T - 1) * B, :]                     # (B, 4)
            for f in range(future):                      # truly serial: keep per-step
                xg = jnp.dot(last, w_ih[0], preferred_element_type=jnp.float32)
                h, c = stack_step(xg, h, c)
                last = (jnp.dot(h[num_layers - 1], w_lin,
                                preferred_element_type=jnp.float32) + b_lin)
                out_ref[pl.ds((T + f) * B, B), :] = last

    return kernel


def lstm_net_pallas(x_flat, params, future, batch):
    """x_flat: (T*B, 4) in t-major/b-minor order -> ((T+future)*B, 4)."""
    TB, in_size = x_flat.shape
    B = batch
    T = TB // B
    H = params["n_hidden"]
    L = params["num_layers"]
    flat = params["flat_weights"]
    if future > 0:
        assert T >= 2, "need T >= 2 for the output[-2:-1] future-seed"

    kernel = _make_lstm_net_kernel(T, B, H, L, future)
    n_in = 1 + len(flat)
    vmem_spec = lambda: pl.BlockSpec(memory_space=pltpu.MemorySpace.VMEM)

    return pl.pallas_call(
        kernel,
        out_shape=jax.ShapeDtypeStruct(((T + future) * B, in_size), jnp.float32),
        in_specs=[vmem_spec() for _ in range(n_in)],
        out_specs=vmem_spec(),
        scratch_shapes=[pltpu.VMEM((T * B, H), jnp.float32)],
    )(x_flat, *flat)


# ----------------------------------------------------------------------------
# Parameters (deterministic, PyTorch-style uniform(-1/sqrt(H), 1/sqrt(H))),
# packed into fused-gate layout: W_ih^T (in_l,4H), W_hh^T (H,4H), b (1,4H).
# ----------------------------------------------------------------------------
def init_params(key, n_hidden, num_layers, in_size=4):
    H = n_hidden
    bound = 1.0 / float(H) ** 0.5
    flat_weights = []
    for l in range(num_layers):
        in_l = in_size if l == 0 else H
        key, k1, k2, k3, k4 = jax.random.split(key, 5)
        w_ih = jax.random.uniform(k1, (4 * H, in_l), jnp.float32, -bound, bound)
        w_hh = jax.random.uniform(k2, (4 * H, H), jnp.float32, -bound, bound)
        b_ih = jax.random.uniform(k3, (4 * H,), jnp.float32, -bound, bound)
        b_hh = jax.random.uniform(k4, (4 * H,), jnp.float32, -bound, bound)
        flat_weights += [w_ih.T, w_hh.T, (b_ih + b_hh).reshape(1, 4 * H)]
    key, k1, k2 = jax.random.split(key, 3)
    w_lin = jax.random.uniform(k1, (in_size, H), jnp.float32, -bound, bound)
    b_lin = jax.random.uniform(k2, (in_size,), jnp.float32, -bound, bound)
    flat_weights += [w_lin.T, b_lin.reshape(1, in_size)]
    return {"num_layers": num_layers, "n_hidden": H, "in_size": in_size,
            "flat_weights": flat_weights}


# ----------------------------------------------------------------------------
# Module forward (matches LSTMNet.forward semantics, incl. the future>0 loop).
# The permutes + bitcast reshapes compile into the SAME executable as the kernel
# when this function is jitted (see __main__), so they cost no extra dispatches.
# ----------------------------------------------------------------------------
def lstm_net_forward(x, params, future=0):
    B, in_size, T = x.shape
    x_seq = jnp.transpose(x, (2, 0, 1)).astype(jnp.float32)     # (T, B, 4)
    x_flat = x_seq.reshape(T * B, in_size)                      # bitcast
    out_flat = lstm_net_pallas(x_flat, params, future, batch=B) # ((T+future)*B, 4)
    out_seq = out_flat.reshape(T + future, B, in_size)          # bitcast
    return jnp.transpose(out_seq, (1, 2, 0))                    # (B, 4, T+future)


# ----------------------------------------------------------------------------
# Pure-JAX reference (independent math: exp-based sigmoid, HIGHEST precision dots)
# ----------------------------------------------------------------------------
def lstm_net_forward_ref(x, params, future=0):
    H, L = params["n_hidden"], params["num_layers"]
    flat = params["flat_weights"]
    w_ih = [flat[3 * l + 0] for l in range(L)]
    w_hh = [flat[3 * l + 1] for l in range(L)]
    bias = [flat[3 * l + 2] for l in range(L)]
    w_lin, b_lin = flat[3 * L], flat[3 * L + 1]
    hi = jax.lax.Precision.HIGHEST

    x_seq = jnp.transpose(x, (2, 0, 1)).astype(jnp.float32)
    T, B, _ = x_seq.shape
    h = [jnp.zeros((B, H), jnp.float32) for _ in range(L)]
    c = [jnp.zeros((B, H), jnp.float32) for _ in range(L)]

    def cell(inp, h, c):
        h, c = list(h), list(c)
        for l in range(L):
            g = (jnp.dot(inp, w_ih[l], precision=hi)
                 + jnp.dot(h[l], w_hh[l], precision=hi) + bias[l])
            i_g = _sigmoid_exp(g[:, 0:H])
            f_g = _sigmoid_exp(g[:, H:2 * H])
            g_g = jnp.tanh(g[:, 2 * H:3 * H])
            o_g = _sigmoid_exp(g[:, 3 * H:4 * H])
            c[l] = f_g * c[l] + i_g * g_g
            h[l] = o_g * jnp.tanh(c[l])
            inp = h[l]
        y = jnp.dot(inp, w_lin, precision=hi) + b_lin
        return y, h, c

    ys = []
    for t in range(T):
        y, h, c = cell(x_seq[t], h, c)
        ys.append(y)
    last = ys[T - 2]                                            # output[-2:-1] quirk
    for _ in range(future):
        last, h, c = cell(last, h, c)
        ys.append(last)
    out = jnp.stack(ys, axis=0)                                 # (T+future, B, 4)
    return jnp.transpose(out, (1, 2, 0))


if __name__ == "__main__":
    key = jax.random.PRNGKey(0)
    pkey, xkey = jax.random.split(key)

    n_hidden, num_layers = 32, 2
    batch, seq, future = 2, 8, 2

    params = init_params(pkey, n_hidden, num_layers)
    x = jax.random.normal(xkey, (batch, 4, seq), jnp.float32)

    # One jitted executable: permute -> (bitcast) -> Pallas kernel -> (bitcast) -> permute.
    fwd = jax.jit(lambda xx: lstm_net_forward(xx, params, future=future))
    out = jax.block_until_ready(fwd(x))

    assert out.shape == (batch, 4, seq + future), out.shape
    ref = lstm_net_forward_ref(x, params, future=future)
    assert jnp.allclose(out, ref, atol=5e-4, rtol=5e-4), (
        float(jnp.max(jnp.abs(out - ref))))

    print("KERNEL_OK")
</pallas_src>

<mosaic_0001>
module attributes {stable_mosaic.version = 11 : i64} {
  func.func @kernel(%arg0: memref<16x4xf32, #tpu.memory_space<vmem>>, %arg1: memref<4x128xf32, #tpu.memory_space<vmem>>, %arg2: memref<32x128xf32, #tpu.memory_space<vmem>>, %arg3: memref<1x128xf32, #tpu.memory_space<vmem>>, %arg4: memref<32x128xf32, #tpu.memory_space<vmem>>, %arg5: memref<32x128xf32, #tpu.memory_space<vmem>>, %arg6: memref<1x128xf32, #tpu.memory_space<vmem>>, %arg7: memref<32x4xf32, #tpu.memory_space<vmem>>, %arg8: memref<1x4xf32, #tpu.memory_space<vmem>>, %arg9: memref<20x4xf32, #tpu.memory_space<vmem>>, %arg10: memref<16x32xf32, #tpu.memory_space<vmem>>) attributes {dimension_semantics = [], scalar_prefetch = 0 : i64, scratch_operands = 1 : i64, tpu.core_type = #tpu.core_type<tc>} {
    %c0 = arith.constant 0 : index
    %c0_0 = arith.constant 0 : index
    %0 = vector.load %arg1[%c0, %c0_0] : memref<4x128xf32, #tpu.memory_space<vmem>>, vector<4x128xf32>
    %c0_1 = arith.constant 0 : index
    %c0_2 = arith.constant 0 : index
    %1 = vector.load %arg4[%c0_1, %c0_2] : memref<32x128xf32, #tpu.memory_space<vmem>>, vector<32x128xf32>
    %c0_3 = arith.constant 0 : index
    %c0_4 = arith.constant 0 : index
    %2 = vector.load %arg2[%c0_3, %c0_4] : memref<32x128xf32, #tpu.memory_space<vmem>>, vector<32x128xf32>
    %c0_5 = arith.constant 0 : index
    %c0_6 = arith.constant 0 : index
    %3 = vector.load %arg5[%c0_5, %c0_6] : memref<32x128xf32, #tpu.memory_space<vmem>>, vector<32x128xf32>
    %c0_7 = arith.constant 0 : index
    %c0_8 = arith.constant 0 : index
    %4 = vector.load %arg3[%c0_7, %c0_8] : memref<1x128xf32, #tpu.memory_space<vmem>>, vector<1x128xf32>
    %c0_9 = arith.constant 0 : index
    %c0_10 = arith.constant 0 : index
    %5 = vector.load %arg6[%c0_9, %c0_10] : memref<1x128xf32, #tpu.memory_space<vmem>>, vector<1x128xf32>
    %c0_11 = arith.constant 0 : index
    %c0_12 = arith.constant 0 : index
    %6 = vector.load %arg7[%c0_11, %c0_12] : memref<32x4xf32, #tpu.memory_space<vmem>>, vector<32x4xf32>
    %c0_13 = arith.constant 0 : index
    %c0_14 = arith.constant 0 : index
    %7 = vector.load %arg8[%c0_13, %c0_14] : memref<1x4xf32, #tpu.memory_space<vmem>>, vector<1x4xf32>
    %c0_15 = arith.constant 0 : index
    %c0_16 = arith.constant 0 : index
    %8 = vector.load %arg0[%c0_15, %c0_16] : memref<16x4xf32, #tpu.memory_space<vmem>>, vector<16x4xf32>
    %cst = arith.constant dense<0.000000e+00> : vector<16x128xf32>
    %9 = tpu.matmul %8, %0, %cst {dimension_numbers = #tpu.dot_dimension_numbers<[1], [0], [0], [1], [0, 0, 1, 1], [], []>} : vector<16x4xf32>, vector<4x128xf32>, vector<16x128xf32> -> vector<16x128xf32>
    %cst_17 = arith.constant 0.000000e+00 : f32
    %10 = vector.broadcast %cst_17 : f32 to vector<2x32xf32>
    %cst_18 = arith.constant 0.000000e+00 : f32
    %11 = vector.broadcast %cst_18 : f32 to vector<2x32xf32>
    %cst_19 = arith.constant 0.000000e+00 : f32
    %12 = vector.broadcast %cst_19 : f32 to vector<2x32xf32>
    %cst_20 = arith.constant 0.000000e+00 : f32
    %13 = vector.broadcast %cst_20 : f32 to vector<2x32xf32>
    %14 = vector.extract_strided_slice %9 {offsets = [0, 0], sizes = [2, 128], strides = [1, 1]} : vector<16x128xf32> to vector<2x128xf32>
    %cst_21 = arith.constant dense<0.000000e+00> : vector<2x128xf32>
    %15 = tpu.matmul %10, %2, %cst_21 {dimension_numbers = #tpu.dot_dimension_numbers<[1], [0], [0], [1], [0, 0, 1, 1], [], []>} : vector<2x32xf32>, vector<32x128xf32>, vector<2x128xf32> -> vector<2x128xf32>
    %16 = arith.addf %14, %15 : vector<2x128xf32>
    %17 = vector.broadcast %4 : vector<1x128xf32> to vector<2x128xf32>
    %18 = arith.addf %16, %17 : vector<2x128xf32>
    %cst_22 = arith.constant 5.000000e-01 : f32
    %19 = vector.broadcast %cst_22 : f32 to vector<2x128xf32>
    %20 = arith.mulf %19, %18 : vector<2x128xf32>
    %21 = math.tanh %20 : vector<2x128xf32>
    %cst_23 = arith.constant 5.000000e-01 : f32
    %22 = vector.broadcast %cst_23 : f32 to vector<2x128xf32>
    %23 = arith.mulf %22, %21 : vector<2x128xf32>
    %cst_24 = arith.constant 5.000000e-01 : f32
    %24 = vector.broadcast %cst_24 : f32 to vector<2x128xf32>
    %25 = arith.addf %23, %24 : vector<2x128xf32>
    %26 = math.tanh %18 : vector<2x128xf32>
    %27 = vector.extract_strided_slice %25 {offsets = [0, 0], sizes = [2, 32], strides = [1, 1]} : vector<2x128xf32> to vector<2x32xf32>
    %28 = vector.extract_strided_slice %25 {offsets = [0, 32], sizes = [2, 32], strides = [1, 1]} : vector<2x128xf32> to vector<2x32xf32>
    %29 = vector.extract_strided_slice %26 {offsets = [0, 64], sizes = [2, 32], strides = [1, 1]} : vector<2x128xf32> to vector<2x32xf32>
    %30 = vector.extract_strided_slice %25 {offsets = [0, 96], sizes = [2, 32], strides = [1, 1]} : vector<2x128xf32> to vector<2x32xf32>
    %31 = arith.mulf %28, %12 : vector<2x32xf32>
    %32 = arith.mulf %27, %29 : vector<2x32xf32>
    %33 = arith.addf %31, %32 : vector<2x32xf32>
    %34 = math.tanh %33 : vector<2x32xf32>
    %35 = arith.mulf %30, %34 : vector<2x32xf32>
    %cst_25 = arith.constant dense<0.000000e+00> : vector<2x128xf32>
    %36 = tpu.matmul %35, %1, %cst_25 {dimension_numbers = #tpu.dot_dimension_numbers<[1], [0], [0], [1], [0, 0, 1, 1], [], []>} : vector<2x32xf32>, vector<32x128xf32>, vector<2x128xf32> -> vector<2x128xf32>
    %cst_26 = arith.constant dense<0.000000e+00> : vector<2x128xf32>
    %37 = tpu.matmul %11, %3, %cst_26 {dimension_numbers = #tpu.dot_dimension_numbers<[1], [0], [0], [1], [0, 0, 1, 1], [], []>} : vector<2x32xf32>, vector<32x128xf32>, vector<2x128xf32> -> vector<2x128xf32>
    %38 = arith.addf %36, %37 : vector<2x128xf32>
    %39 = vector.broadcast %5 : vector<1x128xf32> to vector<2x128xf32>
    %40 = arith.addf %38, %39 : vector<2x128xf32>
    %cst_27 = arith.constant 5.000000e-01 : f32
    %41 = vector.broadcast %cst_27 : f32 to vector<2x128xf32>
    %42 = arith.mulf %41, %40 : vector<2x128xf32>
    %43 = math.tanh %42 : vector<2x128xf32>
    %cst_28 = arith.constant 5.000000e-01 : f32
    %44 = vector.broadcast %cst_28 : f32 to vector<2x128xf32>
    %45 = arith.mulf %44, %43 : vector<2x128xf32>
    %cst_29 = arith.constant 5.000000e-01 : f32
    %46 = vector.broadcast %cst_29 : f32 to vector<2x128xf32>
    %47 = arith.addf %45, %46 : vector<2x128xf32>
    %48 = math.tanh %40 : vector<2x128xf32>
    %49 = vector.extract_strided_slice %47 {offsets = [0, 0], sizes = [2, 32], strides = [1, 1]} : vector<2x128xf32> to vector<2x32xf32>
    %50 = vector.extract_strided_slice %47 {offsets = [0, 32], sizes = [2, 32], strides = [1, 1]} : vector<2x128xf32> to vector<2x32xf32>
    %51 = vector.extract_strided_slice %48 {offsets = [0, 64], sizes = [2, 32], strides = [1, 1]} : vector<2x128xf32> to vector<2x32xf32>
    %52 = vector.extract_strided_slice %47 {offsets = [0, 96], sizes = [2, 32], strides = [1, 1]} : vector<2x128xf32> to vector<2x32xf32>
    %53 = arith.mulf %50, %13 : vector<2x32xf32>
    %54 = arith.mulf %49, %51 : vector<2x32xf32>
    %55 = arith.addf %53, %54 : vector<2x32xf32>
    %56 = math.tanh %55 : vector<2x32xf32>
    %57 = arith.mulf %52, %56 : vector<2x32xf32>
    %c0_30 = arith.constant 0 : index
    %c0_31 = arith.constant 0 : index
    %58 = vector.load %arg10[%c0_30, %c0_31] : memref<16x32xf32, #tpu.memory_space<vmem>>, vector<2x32xf32>
    tpu.vector_store %arg10[%c0_30, %c0_31], %57 {strides = array<i32>} : memref<16x32xf32, #tpu.memory_space<vmem>>, vector<2x32xf32>,
    %59 = vector.extract_strided_slice %9 {offsets = [2, 0], sizes = [2, 128], strides = [1, 1]} : vector<16x128xf32> to vector<2x128xf32>
    %cst_32 = arith.constant dense<0.000000e+00> : vector<2x128xf32>
    %60 = tpu.matmul %35, %2, %cst_32 {dimension_numbers = #tpu.dot_dimension_numbers<[1], [0], [0], [1], [0, 0, 1, 1], [], []>} : vector<2x32xf32>, vector<32x128xf32>, vector<2x128xf32> -> vector<2x128xf32>
    %61 = arith.addf %59, %60 : vector<2x128xf32>
    %62 = vector.broadcast %4 : vector<1x128xf32> to vector<2x128xf32>
    %63 = arith.addf %61, %62 : vector<2x128xf32>
    %cst_33 = arith.constant 5.000000e-01 : f32
    %64 = vector.broadcast %cst_33 : f32 to vector<2x128xf32>
    %65 = arith.mulf %64, %63 : vector<2x128xf32>
    %66 = math.tanh %65 : vector<2x128xf32>
    %cst_34 = arith.constant 5.000000e-01 : f32
    %67 = vector.broadcast %cst_34 : f32 to vector<2x128xf32>
    %68 = arith.mulf %67, %66 : vector<2x128xf32>
    %cst_35 = arith.constant 5.000000e-01 : f32
    %69 = vector.broadcast %cst_35 : f32 to vector<2x128xf32>
    %70 = arith.addf %68, %69 : vector<2x128xf32>
    %71 = math.tanh %63 : vector<2x128xf32>
    %72 = vector.extract_strided_slice %70 {offsets = [0, 0], sizes = [2, 32], strides = [1, 1]} : vector<2x128xf32> to vector<2x32xf32>
    %73 = vector.extract_strided_slice %70 {offsets = [0, 32], sizes = [2, 32], strides = [1, 1]} : vector<2x128xf32> to vector<2x32xf32>
    %74 = vector.extract_strided_slice %71 {offsets = [0, 64], sizes = [2, 32], strides = [1, 1]} : vector<2x128xf32> to vector<2x32xf32>
    %75 = vector.extract_strided_slice %70 {offsets = [0, 96], sizes = [2, 32], strides = [1, 1]} : vector<2x128xf32> to vector<2x32xf32>
    %76 = arith.mulf %73, %33 : vector<2x32xf32>
    %77 = arith.mulf %72, %74 : vector<2x32xf32>
    %78 = arith.addf %76, %77 : vector<2x32xf32>
    %79 = math.tanh %78 : vector<2x32xf32>
    %80 = arith.mulf %75, %79 : vector<2x32xf32>
    %cst_36 = arith.constant dense<0.000000e+00> : vector<2x128xf32>
    %81 = tpu.matmul %80, %1, %cst_36 {dimension_numbers = #tpu.dot_dimension_numbers<[1], [0], [0], [1], [0, 0, 1, 1], [], []>} : vector<2x32xf32>, vector<32x128xf32>, vector<2x128xf32> -> vector<2x128xf32>
    %cst_37 = arith.constant dense<0.000000e+00> : vector<2x128xf32>
    %82 = tpu.matmul %57, %3, %cst_37 {dimension_numbers = #tpu.dot_dimension_numbers<[1], [0], [0], [1], [0, 0, 1, 1], [], []>} : vector<2x32xf32>, vector<32x128xf32>, vector<2x128xf32> -> vector<2x128xf32>
    %83 = arith.addf %81, %82 : vector<2x128xf32>
    %84 = vector.broadcast %5 : vector<1x128xf32> to vector<2x128xf32>
    %85 = arith.addf %83, %84 : vector<2x128xf32>
    %cst_38 = arith.constant 5.000000e-01 : f32
    %86 = vector.broadcast %cst_38 : f32 to vector<2x128xf32>
    %87 = arith.mulf %86, %85 : vector<2x128xf32>
    %88 = math.tanh %87 : vector<2x128xf32>
    %cst_39 = arith.constant 5.000000e-01 : f32
    %89 = vector.broadcast %cst_39 : f32 to vector<2x128xf32>
    %90 = arith.mulf %89, %88 : vector<2x128xf32>
    %cst_40 = arith.constant 5.000000e-01 : f32
    %91 = vector.broadcast %cst_40 : f32 to vector<2x128xf32>
    %92 = arith.addf %90, %91 : vector<2x128xf32>
    %93 = math.tanh %85 : vector<2x128xf32>
    %94 = vector.extract_strided_slice %92 {offsets = [0, 0], sizes = [2, 32], strides = [1, 1]} : vector<2x128xf32> to vector<2x32xf32>
    %95 = vector.extract_strided_slice %92 {offsets = [0, 32], sizes = [2, 32], strides = [1, 1]} : vector<2x128xf32> to vector<2x32xf32>
    %96 = vector.extract_strided_slice %93 {offsets = [0, 64], sizes = [2, 32], strides = [1, 1]} : vector<2x128xf32> to vector<2x32xf32>
    %97 = vector.extract_strided_slice %92 {offsets = [0, 96], sizes = [2, 32], strides = [1, 1]} : vector<2x128xf32> to vector<2x32xf32>
    %98 = arith.mulf %95, %55 : vector<2x32xf32>
    %99 = arith.mulf %94, %96 : vector<2x32xf32>
    %100 = arith.addf %98, %99 : vector<2x32xf32>
    %101 = math.tanh %100 : vector<2x32xf32>
    %102 = arith.mulf %97, %101 : vector<2x32xf32>
    %c2 = arith.constant 2 : index
    %c0_41 = arith.constant 0 : index
    %103 = vector.load %arg10[%c2, %c0_41] : memref<16x32xf32, #tpu.memory_space<vmem>>, vector<2x32xf32>
    tpu.vector_store %arg10[%c2, %c0_41], %102 {strides = array<i32>} : memref<16x32xf32, #tpu.memory_space<vmem>>, vector<2x32xf32>,
    %104 = vector.extract_strided_slice %9 {offsets = [4, 0], sizes = [2, 128], strides = [1, 1]} : vector<16x128xf32> to vector<2x128xf32>
    %cst_42 = arith.constant dense<0.000000e+00> : vector<2x128xf32>
    %105 = tpu.matmul %80, %2, %cst_42 {dimension_numbers = #tpu.dot_dimension_numbers<[1], [0], [0], [1], [0, 0, 1, 1], [], []>} : vector<2x32xf32>, vector<32x128xf32>, vector<2x128xf32> -> vector<2x128xf32>
    %106 = arith.addf %104, %105 : vector<2x128xf32>
    %107 = vector.broadcast %4 : vector<1x128xf32> to vector<2x128xf32>
    %108 = arith.addf %106, %107 : vector<2x128xf32>
    %cst_43 = arith.constant 5.000000e-01 : f32
    %109 = vector.broadcast %cst_43 : f32 to vector<2x128xf32>
    %110 = arith.mulf %109, %108 : vector<2x128xf32>
    %111 = math.tanh %110 : vector<2x128xf32>
    %cst_44 = arith.constant 5.000000e-01 : f32
    %112 = vector.broadcast %cst_44 : f32 to vector<2x128xf32>
    %113 = arith.mulf %112, %111 : vector<2x128xf32>
    %cst_45 = arith.constant 5.000000e-01 : f32
    %114 = vector.broadcast %cst_45 : f32 to vector<2x128xf32>
    %115 = arith.addf %113, %114 : vector<2x128xf32>
    %116 = math.tanh %108 : vector<2x128xf32>
    %117 = vector.extract_strided_slice %115 {offsets = [0, 0], sizes = [2, 32], strides = [1, 1]} : vector<2x128xf32> to vector<2x32xf32>
    %118 = vector.extract_strided_slice %115 {offsets = [0, 32], sizes = [2, 32], strides = [1, 1]} : vector<2x128xf32> to vector<2x32xf32>
    %119 = vector.extract_strided_slice %116 {offsets = [0, 64], sizes = [2, 32], strides = [1, 1]} : vector<2x128xf32> to vector<2x32xf32>
    %120 = vector.extract_strided_slice %115 {offsets = [0, 96], sizes = [2, 32], strides = [1, 1]} : vector<2x128xf32> to vector<2x32xf32>
    %121 = arith.mulf %118, %78 : vector<2x32xf32>
    %122 = arith.mulf %117, %119 : vector<2x32xf32>
    %123 = arith.addf %121, %122 : vector<2x32xf32>
    %124 = math.tanh %123 : vector<2x32xf32>
    %125 = arith.mulf %120, %124 : vector<2x32xf32>
    %cst_46 = arith.constant dense<0.000000e+00> : vector<2x128xf32>
    %126 = tpu.matmul %125, %1, %cst_46 {dimension_numbers = #tpu.dot_dimension_numbers<[1], [0], [0], [1], [0, 0, 1, 1], [], []>} : vector<2x32xf32>, vector<32x128xf32>, vector<2x128xf32> -> vector<2x128xf32>
    %cst_47 = arith.constant dense<0.000000e+00> : vector<2x128xf32>
    %127 = tpu.matmul %102, %3, %cst_47 {dimension_numbers = #tpu.dot_dimension_numbers<[1], [0], [0], [1], [0, 0, 1, 1], [], []>} : vector<2x32xf32>, vector<32x128xf32>, vector<2x128xf32> -> vector<2x128xf32>
    %128 = arith.addf %126, %127 : vector<2x128xf32>
    %129 = vector.broadcast %5 : vector<1x128xf32> to vector<2x128xf32>
    %130 = arith.addf %128, %129 : vector<2x128xf32>
    %cst_48 = arith.constant 5.000000e-01 : f32
    %131 = vector.broadcast %cst_48 : f32 to vector<2x128xf32>
    %132 = arith.mulf %131, %130 : vector<2x128xf32>
    %133 = math.tanh %132 : vector<2x128xf32>
    %cst_49 = arith.constant 5.000000e-01 : f32
    %134 = vector.broadcast %cst_49 : f32 to vector<2x128xf32>
    %135 = arith.mulf %134, %133 : vector<2x128xf32>
    %cst_50 = arith.constant 5.000000e-01 : f32
    %136 = vector.broadcast %cst_50 : f32 to vector<2x128xf32>
    %137 = arith.addf %135, %136 : vector<2x128xf32>
    %138 = math.tanh %130 : vector<2x128xf32>
    %139 = vector.extract_strided_slice %137 {offsets = [0, 0], sizes = [2, 32], strides = [1, 1]} : vector<2x128xf32> to vector<2x32xf32>
    %140 = vector.extract_strided_slice %137 {offsets = [0, 32], sizes = [2, 32], strides = [1, 1]} : vector<2x128xf32> to vector<2x32xf32>
    %141 = vector.extract_strided_slice %138 {offsets = [0, 64], sizes = [2, 32], strides = [1, 1]} : vector<2x128xf32> to vector<2x32xf32>
    %142 = vector.extract_strided_slice %137 {offsets = [0, 96], sizes = [2, 32], strides = [1, 1]} : vector<2x128xf32> to vector<2x32xf32>
    %143 = arith.mulf %140, %100 : vector<2x32xf32>
    %144 = arith.mulf %139, %141 : vector<2x32xf32>
    %145 = arith.addf %143, %144 : vector<2x32xf32>
    %146 = math.tanh %145 : vector<2x32xf32>
    %147 = arith.mulf %142, %146 : vector<2x32xf32>
    %c4 = arith.constant 4 : index
    %c0_51 = arith.constant 0 : index
    %148 = vector.load %arg10[%c4, %c0_51] : memref<16x32xf32, #tpu.memory_space<vmem>>, vector<2x32xf32>
    tpu.vector_store %arg10[%c4, %c0_51], %147 {strides = array<i32>} : memref<16x32xf32, #tpu.memory_space<vmem>>, vector<2x32xf32>,
    %149 = vector.extract_strided_slice %9 {offsets = [6, 0], sizes = [2, 128], strides = [1, 1]} : vector<16x128xf32> to vector<2x128xf32>
    %cst_52 = arith.constant dense<0.000000e+00> : vector<2x128xf32>
    %150 = tpu.matmul %125, %2, %cst_52 {dimension_numbers = #tpu.dot_dimension_numbers<[1], [0], [0], [1], [0, 0, 1, 1], [], []>} : vector<2x32xf32>, vector<32x128xf32>, vector<2x128xf32> -> vector<2x128xf32>
    %151 = arith.addf %149, %150 : vector<2x128xf32>
    %152 = vector.broadcast %4 : vector<1x128xf32> to vector<2x128xf32>
    %153 = arith.addf %151, %152 : vector<2x128xf32>
    %cst_53 = arith.constant 5.000000e-01 : f32
    %154 = vector.broadcast %cst_53 : f32 to vector<2x128xf32>
    %155 = arith.mulf %154, %153 : vector<2x128xf32>
    %156 = math.tanh %155 : vector<2x128xf32>
    %cst_54 = arith.constant 5.000000e-01 : f32
    %157 = vector.broadcast %cst_54 : f32 to vector<2x128xf32>
    %158 = arith.mulf %157, %156 : vector<2x128xf32>
    %cst_55 = arith.constant 5.000000e-01 : f32
    %159 = vector.broadcast %cst_55 : f32 to vector<2x128xf32>
    %160 = arith.addf %158, %159 : vector<2x128xf32>
    %161 = math.tanh %153 : vector<2x128xf32>
    %162 = vector.extract_strided_slice %160 {offsets = [0, 0], sizes = [2, 32], strides = [1, 1]} : vector<2x128xf32> to vector<2x32xf32>
    %163 = vector.extract_strided_slice %160 {offsets = [0, 32], sizes = [2, 32], strides = [1, 1]} : vector<2x128xf32> to vector<2x32xf32>
    %164 = vector.extract_strided_slice %161 {offsets = [0, 64], sizes = [2, 32], strides = [1, 1]} : vector<2x128xf32> to vector<2x32xf32>
    %165 = vector.extract_strided_slice %160 {offsets = [0, 96], sizes = [2, 32], strides = [1, 1]} : vector<2x128xf32> to vector<2x32xf32>
    %166 = arith.mulf %163, %123 : vector<2x32xf32>
    %167 = arith.mulf %162, %164 : vector<2x32xf32>
    %168 = arith.addf %166, %167 : vector<2x32xf32>
    %169 = math.tanh %168 : vector<2x32xf32>
    %170 = arith.mulf %165, %169 : vector<2x32xf32>
    %cst_56 = arith.constant dense<0.000000e+00> : vector<2x128xf32>
    %171 = tpu.matmul %170, %1, %cst_56 {dimension_numbers = #tpu.dot_dimension_numbers<[1], [0], [0], [1], [0, 0, 1, 1], [], []>} : vector<2x32xf32>, vector<32x128xf32>, vector<2x128xf32> -> vector<2x128xf32>
    %cst_57 = arith.constant dense<0.000000e+00> : vector<2x128xf32>
    %172 = tpu.matmul %147, %3, %cst_57 {dimension_numbers = #tpu.dot_dimension_numbers<[1], [0], [0], [1], [0, 0, 1, 1], [], []>} : vector<2x32xf32>, vector<32x128xf32>, vector<2x128xf32> -> vector<2x128xf32>
    %173 = arith.addf %171, %172 : vector<2x128xf32>
    %174 = vector.broadcast %5 : vector<1x128xf32> to vector<2x128xf32>
    %175 = arith.addf %173, %174 : vector<2x128xf32>
    %cst_58 = arith.constant 5.000000e-01 : f32
    %176 = vector.broadcast %cst_58 : f32 to vector<2x128xf32>
    %177 = arith.mulf %176, %175 : vector<2x128xf32>
    %178 = math.tanh %177 : vector<2x128xf32>
    %cst_59 = arith.constant 5.000000e-01 : f32
    %179 = vector.broadcast %cst_59 : f32 to vector<2x128xf32>
    %180 = arith.mulf %179, %178 : vector<2x128xf32>
    %cst_60 = arith.constant 5.000000e-01 : f32
    %181 = vector.broadcast %cst_60 : f32 to vector<2x128xf32>
    %182 = arith.addf %180, %181 : vector<2x128xf32>
    %183 = math.tanh %175 : vector<2x128xf32>
    %184 = vector.extract_strided_slice %182 {offsets = [0, 0], sizes = [2, 32], strides = [1, 1]} : vector<2x128xf32> to vector<2x32xf32>
    %185 = vector.extract_strided_slice %182 {offsets = [0, 32], sizes = [2, 32], strides = [1, 1]} : vector<2x128xf32> to vector<2x32xf32>
    %186 = vector.extract_strided_slice %183 {offsets = [0, 64], sizes = [2, 32], strides = [1, 1]} : vector<2x128xf32> to vector<2x32xf32>
    %187 = vector.extract_strided_slice %182 {offsets = [0, 96], sizes = [2, 32], strides = [1, 1]} : vector<2x128xf32> to vector<2x32xf32>
    %188 = arith.mulf %185, %145 : vector<2x32xf32>
    %189 = arith.mulf %184, %186 : vector<2x32xf32>
    %190 = arith.addf %188, %189 : vector<2x32xf32>
    %191 = math.tanh %190 : vector<2x32xf32>
    %192 = arith.mulf %187, %191 : vector<2x32xf32>
    %c6 = arith.constant 6 : index
    %c0_61 = arith.constant 0 : index
    %193 = vector.load %arg10[%c6, %c0_61] : memref<16x32xf32, #tpu.memory_space<vmem>>, vector<2x32xf32>
    tpu.vector_store %arg10[%c6, %c0_61], %192 {strides = array<i32>} : memref<16x32xf32, #tpu.memory_space<vmem>>, vector<2x32xf32>,
    %194 = vector.extract_strided_slice %9 {offsets = [8, 0], sizes = [2, 128], strides = [1, 1]} : vector<16x128xf32> to vector<2x128xf32>
    %cst_62 = arith.constant dense<0.000000e+00> : vector<2x128xf32>
    %195 = tpu.matmul %170, %2, %cst_62 {dimension_numbers = #tpu.dot_dimension_numbers<[1], [0], [0], [1], [0, 0, 1, 1], [], []>} : vector<2x32xf32>, vector<32x128xf32>, vector<2x128xf32> -> vector<2x128xf32>
    %196 = arith.addf %194, %195 : vector<2x128xf32>
    %197 = vector.broadcast %4 : vector<1x128xf32> to vector<2x128xf32>
    %198 = arith.addf %196, %197 : vector<2x128xf32>
    %cst_63 = arith.constant 5.000000e-01 : f32
    %199 = vector.broadcast %cst_63 : f32 to vector<2x128xf32>
    %200 = arith.mulf %199, %198 : vector<2x128xf32>
    %201 = math.tanh %200 : vector<2x128xf32>
    %cst_64 = arith.constant 5.000000e-01 : f32
    %202 = vector.broadcast %cst_64 : f32 to vector<2x128xf32>
    %203 = arith.mulf %202, %201 : vector<2x128xf32>
    %cst_65 = arith.constant 5.000000e-01 : f32
    %204 = vector.broadcast %cst_65 : f32 to vector<2x128xf32>
    %205 = arith.addf %203, %204 : vector<2x128xf32>
    %206 = math.tanh %198 : vector<2x128xf32>
    %207 = vector.extract_strided_slice %205 {offsets = [0, 0], sizes = [2, 32], strides = [1, 1]} : vector<2x128xf32> to vector<2x32xf32>
    %208 = vector.extract_strided_slice %205 {offsets = [0, 32], sizes = [2, 32], strides = [1, 1]} : vector<2x128xf32> to vector<2x32xf32>
    %209 = vector.extract_strided_slice %206 {offsets = [0, 64], sizes = [2, 32], strides = [1, 1]} : vector<2x128xf32> to vector<2x32xf32>
    %210 = vector.extract_strided_slice %205 {offsets = [0, 96], sizes = [2, 32], strides = [1, 1]} : vector<2x128xf32> to vector<2x32xf32>
    %211 = arith.mulf %208, %168 : vector<2x32xf32>
    %212 = arith.mulf %207, %209 : vector<2x32xf32>
    %213 = arith.addf %211, %212 : vector<2x32xf32>
    %214 = math.tanh %213 : vector<2x32xf32>
    %215 = arith.mulf %210, %214 : vector<2x32xf32>
    %cst_66 = arith.constant dense<0.000000e+00> : vector<2x128xf32>
    %216 = tpu.matmul %215, %1, %cst_66 {dimension_numbers = #tpu.dot_dimension_numbers<[1], [0], [0], [1], [0, 0, 1, 1], [], []>} : vector<2x32xf32>, vector<32x128xf32>, vector<2x128xf32> -> vector<2x128xf32>
    %cst_67 = arith.constant dense<0.000000e+00> : vector<2x128xf32>
    %217 = tpu.matmul %192, %3, %cst_67 {dimension_numbers = #tpu.dot_dimension_numbers<[1], [0], [0], [1], [0, 0, 1, 1], [], []>} : vector<2x32xf32>, vector<32x128xf32>, vector<2x128xf32> -> vector<2x128xf32>
    %218 = arith.addf %216, %217 : vector<2x128xf32>
    %219 = vector.broadcast %5 : vector<1x128xf32> to vector<2x128xf32>
    %220 = arith.addf %218, %219 : vector<2x128xf32>
    %cst_68 = arith.constant 5.000000e-01 : f32
    %221 = vector.broadcast %cst_68 : f32 to vector<2x128xf32>
    %222 = arith.mulf %221, %220 : vector<2x128xf32>
    %223 = math.tanh %222 : vector<2x128xf32>
    %cst_69 = arith.constant 5.000000e-01 : f32
    %224 = vector.broadcast %cst_69 : f32 to vector<2x128xf32>
    %225 = arith.mulf %224, %223 : vector<2x128xf32>
    %cst_70 = arith.constant 5.000000e-01 : f32
    %226 = vector.broadcast %cst_70 : f32 to vector<2x128xf32>
    %227 = arith.addf %225, %226 : vector<2x128xf32>
    %228 = math.tanh %220 : vector<2x128xf32>
    %229 = vector.extract_strided_slice %227 {offsets = [0, 0], sizes = [2, 32], strides = [1, 1]} : vector<2x128xf32> to vector<2x32xf32>
    %230 = vector.extract_strided_slice %227 {offsets = [0, 32], sizes = [2, 32], strides = [1, 1]} : vector<2x128xf32> to vector<2x32xf32>
    %231 = vector.extract_strided_slice %228 {offsets = [0, 64], sizes = [2, 32], strides = [1, 1]} : vector<2x128xf32> to vector<2x32xf32>
    %232 = vector.extract_strided_slice %227 {offsets = [0, 96], sizes = [2, 32], strides = [1, 1]} : vector<2x128xf32> to vector<2x32xf32>
    %233 = arith.mulf %230, %190 : vector<2x32xf32>
    %234 = arith.mulf %229, %231 : vector<2x32xf32>
    %235 = arith.addf %233, %234 : vector<2x32xf32>
    %236 = math.tanh %235 : vector<2x32xf32>
    %237 = arith.mulf %232, %236 : vector<2x32xf32>
    %c8 = arith.constant 8 : index
    %c0_71 = arith.constant 0 : index
    %238 = vector.load %arg10[%c8, %c0_71] : memref<16x32xf32, #tpu.memory_space<vmem>>, vector<2x32xf32>
    tpu.vector_store %arg10[%c8, %c0_71], %237 {strides = array<i32>} : memref<16x32xf32, #tpu.memory_space<vmem>>, vector<2x32xf32>,
    %239 = vector.extract_strided_slice %9 {offsets = [10, 0], sizes = [2, 128], strides = [1, 1]} : vector<16x128xf32> to vector<2x128xf32>
    %cst_72 = arith.constant dense<0.000000e+00> : vector<2x128xf32>
    %240 = tpu.matmul %215, %2, %cst_72 {dimension_numbers = #tpu.dot_dimension_numbers<[1], [0], [0], [1], [0, 0, 1, 1], [], []>} : vector<2x32xf32>, vector<32x128xf32>, vector<2x128xf32> -> vector<2x128xf32>
    %241 = arith.addf %239, %240 : vector<2x128xf32>
    %242 = vector.broadcast %4 : vector<1x128xf32> to vector<2x128xf32>
    %243 = arith.addf %241, %242 : vector<2x128xf32>
    %cst_73 = arith.constant 5.000000e-01 : f32
    %244 = vector.broadcast %cst_73 : f32 to vector<2x128xf32>
    %245 = arith.mulf %244, %243 : vector<2x128xf32>
    %246 = math.tanh %245 : vector<2x128xf32>
    %cst_74 = arith.constant 5.000000e-01 : f32
    %247 = vector.broadcast %cst_74 : f32 to vector<2x128xf32>
    %248 = arith.mulf %247, %246 : vector<2x128xf32>
    %cst_75 = arith.constant 5.000000e-01 : f32
    %249 = vector.broadcast %cst_75 : f32 to vector<2x128xf32>
    %250 = arith.addf %248, %249 : vector<2x128xf32>
    %251 = math.tanh %243 : vector<2x128xf32>
    %252 = vector.extract_strided_slice %250 {offsets = [0, 0], sizes = [2, 32], strides = [1, 1]} : vector<2x128xf32> to vector<2x32xf32>
    %253 = vector.extract_strided_slice %250 {offsets = [0, 32], sizes = [2, 32], strides = [1, 1]} : vector<2x128xf32> to vector<2x32xf32>
    %254 = vector.extract_strided_slice %251 {offsets = [0, 64], sizes = [2, 32], strides = [1, 1]} : vector<2x128xf32> to vector<2x32xf32>
    %255 = vector.extract_strided_slice %250 {offsets = [0, 96], sizes = [2, 32], strides = [1, 1]} : vector<2x128xf32> to vector<2x32xf32>
    %256 = arith.mulf %253, %213 : vector<2x32xf32>
    %257 = arith.mulf %252, %254 : vector<2x32xf32>
    %258 = arith.addf %256, %257 : vector<2x32xf32>
    %259 = math.tanh %258 : vector<2x32xf32>
    %260 = arith.mulf %255, %259 : vector<2x32xf32>
    %cst_76 = arith.constant dense<0.000000e+00> : vector<2x128xf32>
    %261 = tpu.matmul %260, %1, %cst_76 {dimension_numbers = #tpu.dot_dimension_numbers<[1], [0], [0], [1], [0, 0, 1, 1], [], []>} : vector<2x32xf32>, vector<32x128xf32>, vector<2x128xf32> -> vector<2x128xf32>
    %cst_77 = arith.constant dense<0.000000e+00> : vector<2x128xf32>
    %262 = tpu.matmul %237, %3, %cst_77 {dimension_numbers = #tpu.dot_dimension_numbers<[1], [0], [0], [1], [0, 0, 1, 1], [], []>} : vector<2x32xf32>, vector<32x128xf32>, vector<2x128xf32> -> vector<2x128xf32>
    %263 = arith.addf %261, %262 : vector<2x128xf32>
    %264 = vector.broadcast %5 : vector<1x128xf32> to vector<2x128xf32>
    %265 = arith.addf %263, %264 : vector<2x128xf32>
    %cst_78 = arith.constant 5.000000e-01 : f32
    %266 = vector.broadcast %cst_78 : f32 to vector<2x128xf32>
    %267 = arith.mulf %266, %265 : vector<2x128xf32>
    %268 = math.tanh %267 : vector<2x128xf32>
    %cst_79 = arith.constant 5.000000e-01 : f32
    %269 = vector.broadcast %cst_79 : f32 to vector<2x128xf32>
    %270 = arith.mulf %269, %268 : vector<2x128xf32>
    %cst_80 = arith.constant 5.000000e-01 : f32
    %271 = vector.broadcast %cst_80 : f32 to vector<2x128xf32>
    %272 = arith.addf %270, %271 : vector<2x128xf32>
    %273 = math.tanh %265 : vector<2x128xf32>
    %274 = vector.extract_strided_slice %272 {offsets = [0, 0], sizes = [2, 32], strides = [1, 1]} : vector<2x128xf32> to vector<2x32xf32>
    %275 = vector.extract_strided_slice %272 {offsets = [0, 32], sizes = [2, 32], strides = [1, 1]} : vector<2x128xf32> to vector<2x32xf32>
    %276 = vector.extract_strided_slice %273 {offsets = [0, 64], sizes = [2, 32], strides = [1, 1]} : vector<2x128xf32> to vector<2x32xf32>
    %277 = vector.extract_strided_slice %272 {offsets = [0, 96], sizes = [2, 32], strides = [1, 1]} : vector<2x128xf32> to vector<2x32xf32>
    %278 = arith.mulf %275, %235 : vector<2x32xf32>
    %279 = arith.mulf %274, %276 : vector<2x32xf32>
    %280 = arith.addf %278, %279 : vector<2x32xf32>
    %281 = math.tanh %280 : vector<2x32xf32>
    %282 = arith.mulf %277, %281 : vector<2x32xf32>
    %c10 = arith.constant 10 : index
    %c0_81 = arith.constant 0 : index
    %283 = vector.load %arg10[%c10, %c0_81] : memref<16x32xf32, #tpu.memory_space<vmem>>, vector<2x32xf32>
    tpu.vector_store %arg10[%c10, %c0_81], %282 {strides = array<i32>} : memref<16x32xf32, #tpu.memory_space<vmem>>, vector<2x32xf32>,
    %284 = vector.extract_strided_slice %9 {offsets = [12, 0], sizes = [2, 128], strides = [1, 1]} : vector<16x128xf32> to vector<2x128xf32>
    %cst_82 = arith.constant dense<0.000000e+00> : vector<2x128xf32>
    %285 = tpu.matmul %260, %2, %cst_82 {dimension_numbers = #tpu.dot_dimension_numbers<[1], [0], [0], [1], [0, 0, 1, 1], [], []>} : vector<2x32xf32>, vector<32x128xf32>, vector<2x128xf32> -> vector<2x128xf32>
    %286 = arith.addf %284, %285 : vector<2x128xf32>
    %287 = vector.broadcast %4 : vector<1x128xf32> to vector<2x128xf32>
    %288 = arith.addf %286, %287 : vector<2x128xf32>
    %cst_83 = arith.constant 5.000000e-01 : f32
    %289 = vector.broadcast %cst_83 : f32 to vector<2x128xf32>
    %290 = arith.mulf %289, %288 : vector<2x128xf32>
    %291 = math.tanh %290 : vector<2x128xf32>
    %cst_84 = arith.constant 5.000000e-01 : f32
    %292 = vector.broadcast %cst_84 : f32 to vector<2x128xf32>
    %293 = arith.mulf %292, %291 : vector<2x128xf32>
    %cst_85 = arith.constant 5.000000e-01 : f32
    %294 = vector.broadcast %cst_85 : f32 to vector<2x128xf32>
    %295 = arith.addf %293, %294 : vector<2x128xf32>
    %296 = math.tanh %288 : vector<2x128xf32>
    %297 = vector.extract_strided_slice %295 {offsets = [0, 0], sizes = [2, 32], strides = [1, 1]} : vector<2x128xf32> to vector<2x32xf32>
    %298 = vector.extract_strided_slice %295 {offsets = [0, 32], sizes = [2, 32], strides = [1, 1]} : vector<2x128xf32> to vector<2x32xf32>
    %299 = vector.extract_strided_slice %296 {offsets = [0, 64], sizes = [2, 32], strides = [1, 1]} : vector<2x128xf32> to vector<2x32xf32>
    %300 = vector.extract_strided_slice %295 {offsets = [0, 96], sizes = [2, 32], strides = [1, 1]} : vector<2x128xf32> to vector<2x32xf32>
    %301 = arith.mulf %298, %258 : vector<2x32xf32>
    %302 = arith.mulf %297, %299 : vector<2x32xf32>
    %303 = arith.addf %301, %302 : vector<2x32xf32>
    %304 = math.tanh %303 : vector<2x32xf32>
    %305 = arith.mulf %300, %304 : vector<2x32xf32>
    %cst_86 = arith.constant dense<0.000000e+00> : vector<2x128xf32>
    %306 = tpu.matmul %305, %1, %cst_86 {dimension_numbers = #tpu.dot_dimension_numbers<[1], [0], [0], [1], [0, 0, 1, 1], [], []>} : vector<2x32xf32>, vector<32x128xf32>, vector<2x128xf32> -> vector<2x128xf32>
    %cst_87 = arith.constant dense<0.000000e+00> : vector<2x128xf32>
    %307 = tpu.matmul %282, %3, %cst_87 {dimension_numbers = #tpu.dot_dimension_numbers<[1], [0], [0], [1], [0, 0, 1, 1], [], []>} : vector<2x32xf32>, vector<32x128xf32>, vector<2x128xf32> -> vector<2x128xf32>
    %308 = arith.addf %306, %307 : vector<2x128xf32>
    %309 = vector.broadcast %5 : vector<1x128xf32> to vector<2x128xf32>
    %310 = arith.addf %308, %309 : vector<2x128xf32>
    %cst_88 = arith.constant 5.000000e-01 : f32
    %311 = vector.broadcast %cst_88 : f32 to vector<2x128xf32>
    %312 = arith.mulf %311, %310 : vector<2x128xf32>
    %313 = math.tanh %312 : vector<2x128xf32>
    %cst_89 = arith.constant 5.000000e-01 : f32
    %314 = vector.broadcast %cst_89 : f32 to vector<2x128xf32>
    %315 = arith.mulf %314, %313 : vector<2x128xf32>
    %cst_90 = arith.constant 5.000000e-01 : f32
    %316 = vector.broadcast %cst_90 : f32 to vector<2x128xf32>
    %317 = arith.addf %315, %316 : vector<2x128xf32>
    %318 = math.tanh %310 : vector<2x128xf32>
    %319 = vector.extract_strided_slice %317 {offsets = [0, 0], sizes = [2, 32], strides = [1, 1]} : vector<2x128xf32> to vector<2x32xf32>
    %320 = vector.extract_strided_slice %317 {offsets = [0, 32], sizes = [2, 32], strides = [1, 1]} : vector<2x128xf32> to vector<2x32xf32>
    %321 = vector.extract_strided_slice %318 {offsets = [0, 64], sizes = [2, 32], strides = [1, 1]} : vector<2x128xf32> to vector<2x32xf32>
    %322 = vector.extract_strided_slice %317 {offsets = [0, 96], sizes = [2, 32], strides = [1, 1]} : vector<2x128xf32> to vector<2x32xf32>
    %323 = arith.mulf %320, %280 : vector<2x32xf32>
    %324 = arith.mulf %319, %321 : vector<2x32xf32>
    %325 = arith.addf %323, %324 : vector<2x32xf32>
    %326 = math.tanh %325 : vector<2x32xf32>
    %327 = arith.mulf %322, %326 : vector<2x32xf32>
    %c12 = arith.constant 12 : index
    %c0_91 = arith.constant 0 : index
    %328 = vector.load %arg10[%c12, %c0_91] : memref<16x32xf32, #tpu.memory_space<vmem>>, vector<2x32xf32>
    tpu.vector_store %arg10[%c12, %c0_91], %327 {strides = array<i32>} : memref<16x32xf32, #tpu.memory_space<vmem>>, vector<2x32xf32>,
    %329 = vector.extract_strided_slice %9 {offsets = [14, 0], sizes = [2, 128], strides = [1, 1]} : vector<16x128xf32> to vector<2x128xf32>
    %cst_92 = arith.constant dense<0.000000e+00> : vector<2x128xf32>
    %330 = tpu.matmul %305, %2, %cst_92 {dimension_numbers = #tpu.dot_dimension_numbers<[1], [0], [0], [1], [0, 0, 1, 1], [], []>} : vector<2x32xf32>, vector<32x128xf32>, vector<2x128xf32> -> vector<2x128xf32>
    %331 = arith.addf %329, %330 : vector<2x128xf32>
    %332 = vector.broadcast %4 : vector<1x128xf32> to vector<2x128xf32>
    %333 = arith.addf %331, %332 : vector<2x128xf32>
    %cst_93 = arith.constant 5.000000e-01 : f32
    %334 = vector.broadcast %cst_93 : f32 to vector<2x128xf32>
    %335 = arith.mulf %334, %333 : vector<2x128xf32>
    %336 = math.tanh %335 : vector<2x128xf32>
    %cst_94 = arith.constant 5.000000e-01 : f32
    %337 = vector.broadcast %cst_94 : f32 to vector<2x128xf32>
    %338 = arith.mulf %337, %336 : vector<2x128xf32>
    %cst_95 = arith.constant 5.000000e-01 : f32
    %339 = vector.broadcast %cst_95 : f32 to vector<2x128xf32>
    %340 = arith.addf %338, %339 : vector<2x128xf32>
    %341 = math.tanh %333 : vector<2x128xf32>
    %342 = vector.extract_strided_slice %340 {offsets = [0, 0], sizes = [2, 32], strides = [1, 1]} : vector<2x128xf32> to vector<2x32xf32>
    %343 = vector.extract_strided_slice %340 {offsets = [0, 32], sizes = [2, 32], strides = [1, 1]} : vector<2x128xf32> to vector<2x32xf32>
    %344 = vector.extract_strided_slice %341 {offsets = [0, 64], sizes = [2, 32], strides = [1, 1]} : vector<2x128xf32> to vector<2x32xf32>
    %345 = vector.extract_strided_slice %340 {offsets = [0, 96], sizes = [2, 32], strides = [1, 1]} : vector<2x128xf32> to vector<2x32xf32>
    %346 = arith.mulf %343, %303 : vector<2x32xf32>
    %347 = arith.mulf %342, %344 : vector<2x32xf32>
    %348 = arith.addf %346, %347 : vector<2x32xf32>
    %349 = math.tanh %348 : vector<2x32xf32>
    %350 = arith.mulf %345, %349 : vector<2x32xf32>
    %cst_96 = arith.constant dense<0.000000e+00> : vector<2x128xf32>
    %351 = tpu.matmul %350, %1, %cst_96 {dimension_numbers = #tpu.dot_dimension_numbers<[1], [0], [0], [1], [0, 0, 1, 1], [], []>} : vector<2x32xf32>, vector<32x128xf32>, vector<2x128xf32> -> vector<2x128xf32>
    %cst_97 = arith.constant dense<0.000000e+00> : vector<2x128xf32>
    %352 = tpu.matmul %327, %3, %cst_97 {dimension_numbers = #tpu.dot_dimension_numbers<[1], [0], [0], [1], [0, 0, 1, 1], [], []>} : vector<2x32xf32>, vector<32x128xf32>, vector<2x128xf32> -> vector<2x128xf32>
    %353 = arith.addf %351, %352 : vector<2x128xf32>
    %354 = vector.broadcast %5 : vector<1x128xf32> to vector<2x128xf32>
    %355 = arith.addf %353, %354 : vector<2x128xf32>
    %cst_98 = arith.constant 5.000000e-01 : f32
    %356 = vector.broadcast %cst_98 : f32 to vector<2x128xf32>
    %357 = arith.mulf %356, %355 : vector<2x128xf32>
    %358 = math.tanh %357 : vector<2x128xf32>
    %cst_99 = arith.constant 5.000000e-01 : f32
    %359 = vector.broadcast %cst_99 : f32 to vector<2x128xf32>
    %360 = arith.mulf %359, %358 : vector<2x128xf32>
    %cst_100 = arith.constant 5.000000e-01 : f32
    %361 = vector.broadcast %cst_100 : f32 to vector<2x128xf32>
    %362 = arith.addf %360, %361 : vector<2x128xf32>
    %363 = math.tanh %355 : vector<2x128xf32>
    %364 = vector.extract_strided_slice %362 {offsets = [0, 0], sizes = [2, 32], strides = [1, 1]} : vector<2x128xf32> to vector<2x32xf32>
    %365 = vector.extract_strided_slice %362 {offsets = [0, 32], sizes = [2, 32], strides = [1, 1]} : vector<2x128xf32> to vector<2x32xf32>
    %366 = vector.extract_strided_slice %363 {offsets = [0, 64], sizes = [2, 32], strides = [1, 1]} : vector<2x128xf32> to vector<2x32xf32>
    %367 = vector.extract_strided_slice %362 {offsets = [0, 96], sizes = [2, 32], strides = [1, 1]} : vector<2x128xf32> to vector<2x32xf32>
    %368 = arith.mulf %365, %325 : vector<2x32xf32>
    %369 = arith.mulf %364, %366 : vector<2x32xf32>
    %370 = arith.addf %368, %369 : vector<2x32xf32>
    %371 = math.tanh %370 : vector<2x32xf32>
    %372 = arith.mulf %367, %371 : vector<2x32xf32>
    %c14 = arith.constant 14 : index
    %c0_101 = arith.constant 0 : index
    %373 = vector.load %arg10[%c14, %c0_101] : memref<16x32xf32, #tpu.memory_space<vmem>>, vector<2x32xf32>
    tpu.vector_store %arg10[%c14, %c0_101], %372 {strides = array<i32>} : memref<16x32xf32, #tpu.memory_space<vmem>>, vector<2x32xf32>,
    %c0_102 = arith.constant 0 : index
    %c0_103 = arith.constant 0 : index
    %374 = vector.load %arg10[%c0_102, %c0_103] : memref<16x32xf32, #tpu.memory_space<vmem>>, vector<16x32xf32>
    %cst_104 = arith.constant dense<0.000000e+00> : vector<16x4xf32>
    %375 = tpu.matmul %374, %6, %cst_104 {dimension_numbers = #tpu.dot_dimension_numbers<[1], [0], [0], [1], [0, 0, 1, 1], [], []>} : vector<16x32xf32>, vector<32x4xf32>, vector<16x4xf32> -> vector<16x4xf32>
    %376 = vector.broadcast %7 : vector<1x4xf32> to vector<16x4xf32>
    %377 = arith.addf %375, %376 : vector<16x4xf32>
    %c0_105 = arith.constant 0 : index
    %c0_106 = arith.constant 0 : index
    %378 = vector.load %arg9[%c0_105, %c0_106] : memref<20x4xf32, #tpu.memory_space<vmem>>, vector<16x4xf32>
    tpu.vector_store %arg9[%c0_105, %c0_106], %377 {strides = array<i32>} : memref<20x4xf32, #tpu.memory_space<vmem>>, vector<16x4xf32>,
    %379 = vector.extract_strided_slice %377 {offsets = [12, 0], sizes = [2, 4], strides = [1, 1]} : vector<16x4xf32> to vector<2x4xf32>
    %cst_107 = arith.constant dense<0.000000e+00> : vector<2x128xf32>
    %380 = tpu.matmul %379, %0, %cst_107 {dimension_numbers = #tpu.dot_dimension_numbers<[1], [0], [0], [1], [0, 0, 1, 1], [], []>} : vector<2x4xf32>, vector<4x128xf32>, vector<2x128xf32> -> vector<2x128xf32>
    %cst_108 = arith.constant dense<0.000000e+00> : vector<2x128xf32>
    %381 = tpu.matmul %350, %2, %cst_108 {dimension_numbers = #tpu.dot_dimension_numbers<[1], [0], [0], [1], [0, 0, 1, 1], [], []>} : vector<2x32xf32>, vector<32x128xf32>, vector<2x128xf32> -> vector<2x128xf32>
    %382 = arith.addf %380, %381 : vector<2x128xf32>
    %383 = vector.broadcast %4 : vector<1x128xf32> to vector<2x128xf32>
    %384 = arith.addf %382, %383 : vector<2x128xf32>
    %cst_109 = arith.constant 5.000000e-01 : f32
    %385 = vector.broadcast %cst_109 : f32 to vector<2x128xf32>
    %386 = arith.mulf %385, %384 : vector<2x128xf32>
    %387 = math.tanh %386 : vector<2x128xf32>
    %cst_110 = arith.constant 5.000000e-01 : f32
    %388 = vector.broadcast %cst_110 : f32 to vector<2x128xf32>
    %389 = arith.mulf %388, %387 : vector<2x128xf32>
    %cst_111 = arith.constant 5.000000e-01 : f32
    %390 = vector.broadcast %cst_111 : f32 to vector<2x128xf32>
    %391 = arith.addf %389, %390 : vector<2x128xf32>
    %392 = math.tanh %384 : vector<2x128xf32>
    %393 = vector.extract_strided_slice %391 {offsets = [0, 0], sizes = [2, 32], strides = [1, 1]} : vector<2x128xf32> to vector<2x32xf32>
    %394 = vector.extract_strided_slice %391 {offsets = [0, 32], sizes = [2, 32], strides = [1, 1]} : vector<2x128xf32> to vector<2x32xf32>
    %395 = vector.extract_strided_slice %392 {offsets = [0, 64], sizes = [2, 32], strides = [1, 1]} : vector<2x128xf32> to vector<2x32xf32>
    %396 = vector.extract_strided_slice %391 {offsets = [0, 96], sizes = [2, 32], strides = [1, 1]} : vector<2x128xf32> to vector<2x32xf32>
    %397 = arith.mulf %394, %348 : vector<2x32xf32>
    %398 = arith.mulf %393, %395 : vector<2x32xf32>
    %399 = arith.addf %397, %398 : vector<2x32xf32>
    %400 = math.tanh %399 : vector<2x32xf32>
    %401 = arith.mulf %396, %400 : vector<2x32xf32>
    %cst_112 = arith.constant dense<0.000000e+00> : vector<2x128xf32>
    %402 = tpu.matmul %401, %1, %cst_112 {dimension_numbers = #tpu.dot_dimension_numbers<[1], [0], [0], [1], [0, 0, 1, 1], [], []>} : vector<2x32xf32>, vector<32x128xf32>, vector<2x128xf32> -> vector<2x128xf32>
    %cst_113 = arith.constant dense<0.000000e+00> : vector<2x128xf32>
    %403 = tpu.matmul %372, %3, %cst_113 {dimension_numbers = #tpu.dot_dimension_numbers<[1], [0], [0], [1], [0, 0, 1, 1], [], []>} : vector<2x32xf32>, vector<32x128xf32>, vector<2x128xf32> -> vector<2x128xf32>
    %404 = arith.addf %402, %403 : vector<2x128xf32>
    %405 = vector.broadcast %5 : vector<1x128xf32> to vector<2x128xf32>
    %406 = arith.addf %404, %405 : vector<2x128xf32>
    %cst_114 = arith.constant 5.000000e-01 : f32
    %407 = vector.broadcast %cst_114 : f32 to vector<2x128xf32>
    %408 = arith.mulf %407, %406 : vector<2x128xf32>
    %409 = math.tanh %408 : vector<2x128xf32>
    %cst_115 = arith.constant 5.000000e-01 : f32
    %410 = vector.broadcast %cst_115 : f32 to vector<2x128xf32>
    %411 = arith.mulf %410, %409 : vector<2x128xf32>
    %cst_116 = arith.constant 5.000000e-01 : f32
    %412 = vector.broadcast %cst_116 : f32 to vector<2x128xf32>
    %413 = arith.addf %411, %412 : vector<2x128xf32>
    %414 = math.tanh %406 : vector<2x128xf32>
    %415 = vector.extract_strided_slice %413 {offsets = [0, 0], sizes = [2, 32], strides = [1, 1]} : vector<2x128xf32> to vector<2x32xf32>
    %416 = vector.extract_strided_slice %413 {offsets = [0, 32], sizes = [2, 32], strides = [1, 1]} : vector<2x128xf32> to vector<2x32xf32>
    %417 = vector.extract_strided_slice %414 {offsets = [0, 64], sizes = [2, 32], strides = [1, 1]} : vector<2x128xf32> to vector<2x32xf32>
    %418 = vector.extract_strided_slice %413 {offsets = [0, 96], sizes = [2, 32], strides = [1, 1]} : vector<2x128xf32> to vector<2x32xf32>
    %419 = arith.mulf %416, %370 : vector<2x32xf32>
    %420 = arith.mulf %415, %417 : vector<2x32xf32>
    %421 = arith.addf %419, %420 : vector<2x32xf32>
    %422 = math.tanh %421 : vector<2x32xf32>
    %423 = arith.mulf %418, %422 : vector<2x32xf32>
    %cst_117 = arith.constant dense<0.000000e+00> : vector<2x4xf32>
    %424 = tpu.matmul %423, %6, %cst_117 {dimension_numbers = #tpu.dot_dimension_numbers<[1], [0], [0], [1], [0, 0, 1, 1], [], []>} : vector<2x32xf32>, vector<32x4xf32>, vector<2x4xf32> -> vector<2x4xf32>
    %425 = vector.broadcast %7 : vector<1x4xf32> to vector<2x4xf32>
    %426 = arith.addf %424, %425 : vector<2x4xf32>
    %c16 = arith.constant 16 : index
    %c0_118 = arith.constant 0 : index
    %427 = vector.load %arg9[%c16, %c0_118] : memref<20x4xf32, #tpu.memory_space<vmem>>, vector<2x4xf32>
    tpu.vector_store %arg9[%c16, %c0_118], %426 {strides = array<i32>} : memref<20x4xf32, #tpu.memory_space<vmem>>, vector<2x4xf32>,
    %cst_119 = arith.constant dense<0.000000e+00> : vector<2x128xf32>
    %428 = tpu.matmul %426, %0, %cst_119 {dimension_numbers = #tpu.dot_dimension_numbers<[1], [0], [0], [1], [0, 0, 1, 1], [], []>} : vector<2x4xf32>, vector<4x128xf32>, vector<2x128xf32> -> vector<2x128xf32>
    %cst_120 = arith.constant dense<0.000000e+00> : vector<2x128xf32>
    %429 = tpu.matmul %401, %2, %cst_120 {dimension_numbers = #tpu.dot_dimension_numbers<[1], [0], [0], [1], [0, 0, 1, 1], [], []>} : vector<2x32xf32>, vector<32x128xf32>, vector<2x128xf32> -> vector<2x128xf32>
    %430 = arith.addf %428, %429 : vector<2x128xf32>
    %431 = vector.broadcast %4 : vector<1x128xf32> to vector<2x128xf32>
    %432 = arith.addf %430, %431 : vector<2x128xf32>
    %cst_121 = arith.constant 5.000000e-01 : f32
    %433 = vector.broadcast %cst_121 : f32 to vector<2x128xf32>
    %434 = arith.mulf %433, %432 : vector<2x128xf32>
    %435 = math.tanh %434 : vector<2x128xf32>
    %cst_122 = arith.constant 5.000000e-01 : f32
    %436 = vector.broadcast %cst_122 : f32 to vector<2x128xf32>
    %437 = arith.mulf %436, %435 : vector<2x128xf32>
    %cst_123 = arith.constant 5.000000e-01 : f32
    %438 = vector.broadcast %cst_123 : f32 to vector<2x128xf32>
    %439 = arith.addf %437, %438 : vector<2x128xf32>
    %440 = math.tanh %432 : vector<2x128xf32>
    %441 = vector.extract_strided_slice %439 {offsets = [0, 0], sizes = [2, 32], strides = [1, 1]} : vector<2x128xf32> to vector<2x32xf32>
    %442 = vector.extract_strided_slice %439 {offsets = [0, 32], sizes = [2, 32], strides = [1, 1]} : vector<2x128xf32> to vector<2x32xf32>
    %443 = vector.extract_strided_slice %440 {offsets = [0, 64], sizes = [2, 32], strides = [1, 1]} : vector<2x128xf32> to vector<2x32xf32>
    %444 = vector.extract_strided_slice %439 {offsets = [0, 96], sizes = [2, 32], strides = [1, 1]} : vector<2x128xf32> to vector<2x32xf32>
    %445 = arith.mulf %442, %399 : vector<2x32xf32>
    %446 = arith.mulf %441, %443 : vector<2x32xf32>
    %447 = arith.addf %445, %446 : vector<2x32xf32>
    %448 = math.tanh %447 : vector<2x32xf32>
    %449 = arith.mulf %444, %448 : vector<2x32xf32>
    %cst_124 = arith.constant dense<0.000000e+00> : vector<2x128xf32>
    %450 = tpu.matmul %449, %1, %cst_124 {dimension_numbers = #tpu.dot_dimension_numbers<[1], [0], [0], [1], [0, 0, 1, 1], [], []>} : vector<2x32xf32>, vector<32x128xf32>, vector<2x128xf32> -> vector<2x128xf32>
    %cst_125 = arith.constant dense<0.000000e+00> : vector<2x128xf32>
    %451 = tpu.matmul %423, %3, %cst_125 {dimension_numbers = #tpu.dot_dimension_numbers<[1], [0], [0], [1], [0, 0, 1, 1], [], []>} : vector<2x32xf32>, vector<32x128xf32>, vector<2x128xf32> -> vector<2x128xf32>
    %452 = arith.addf %450, %451 : vector<2x128xf32>
    %453 = vector.broadcast %5 : vector<1x128xf32> to vector<2x128xf32>
    %454 = arith.addf %452, %453 : vector<2x128xf32>
    %cst_126 = arith.constant 5.000000e-01 : f32
    %455 = vector.broadcast %cst_126 : f32 to vector<2x128xf32>
    %456 = arith.mulf %455, %454 : vector<2x128xf32>
    %457 = math.tanh %456 : vector<2x128xf32>
    %cst_127 = arith.constant 5.000000e-01 : f32
    %458 = vector.broadcast %cst_127 : f32 to vector<2x128xf32>
    %459 = arith.mulf %458, %457 : vector<2x128xf32>
    %cst_128 = arith.constant 5.000000e-01 : f32
    %460 = vector.broadcast %cst_128 : f32 to vector<2x128xf32>
    %461 = arith.addf %459, %460 : vector<2x128xf32>
    %462 = math.tanh %454 : vector<2x128xf32>
    %463 = vector.extract_strided_slice %461 {offsets = [0, 0], sizes = [2, 32], strides = [1, 1]} : vector<2x128xf32> to vector<2x32xf32>
    %464 = vector.extract_strided_slice %461 {offsets = [0, 32], sizes = [2, 32], strides = [1, 1]} : vector<2x128xf32> to vector<2x32xf32>
    %465 = vector.extract_strided_slice %462 {offsets = [0, 64], sizes = [2, 32], strides = [1, 1]} : vector<2x128xf32> to vector<2x32xf32>
    %466 = vector.extract_strided_slice %461 {offsets = [0, 96], sizes = [2, 32], strides = [1, 1]} : vector<2x128xf32> to vector<2x32xf32>
    %467 = arith.mulf %464, %421 : vector<2x32xf32>
    %468 = arith.mulf %463, %465 : vector<2x32xf32>
    %469 = arith.addf %467, %468 : vector<2x32xf32>
    %470 = math.tanh %469 : vector<2x32xf32>
    %471 = arith.mulf %466, %470 : vector<2x32xf32>
    %cst_129 = arith.constant dense<0.000000e+00> : vector<2x4xf32>
    %472 = tpu.matmul %471, %6, %cst_129 {dimension_numbers = #tpu.dot_dimension_numbers<[1], [0], [0], [1], [0, 0, 1, 1], [], []>} : vector<2x32xf32>, vector<32x4xf32>, vector<2x4xf32> -> vector<2x4xf32>
    %473 = vector.broadcast %7 : vector<1x4xf32> to vector<2x4xf32>
    %474 = arith.addf %472, %473 : vector<2x4xf32>
    %c18 = arith.constant 18 : index
    %c0_130 = arith.constant 0 : index
    %475 = vector.load %arg9[%c18, %c0_130] : memref<20x4xf32, #tpu.memory_space<vmem>>, vector<2x4xf32>
    tpu.vector_store %arg9[%c18, %c0_130], %474 {strides = array<i32>} : memref<20x4xf32, #tpu.memory_space<vmem>>, vector<2x4xf32>,
    return
  }
}

</mosaic_0001>

<bundles_post_ra>
// kernel: _lambda_.1
= control target key start
LH: loop header
LB: loop body
LE: loop exit
PB: predicated region body
PF: predicated region fallthrough
CT: control target
= control target key end

     0   :  { %14 = vsyncpa [#allocation4], 0  ;;  %s4946_s0 = inlined_call_operand.vmem [shape: f32[16,4], index: 0, kind: input, shape index: {}]   ;;  %s4947_s1 = inlined_call_operand.vmem [shape: f32[4,128], index: 1, kind: input, shape index: {}]   ;;  %s4948_s2 = inlined_call_operand.hbm [shape: f32[32,128], index: 2, kind: input, shape index: {}]   ;;  %s4949_s3 = inlined_call_operand.vmem [shape: f32[1,128], index: 3, kind: input, shape index: {}]   ;;  %s4950_s4 = inlined_call_operand.hbm [shape: f32[32,128], index: 4, kind: input, shape index: {}]   ;;  %s4951_s5 = inlined_call_operand.hbm [shape: f32[32,128], index: 5, kind: input, shape index: {}]   ;;  %s4952_s6 = inlined_call_operand.vmem [shape: f32[1,128], index: 6, kind: input, shape index: {}]   ;;  %s4953_s7 = inlined_call_operand.vmem [shape: f32[32,4], index: 7, kind: input, shape index: {}]   ;;  %s4954_s8 = inlined_call_operand.vmem [shape: f32[1,4], index: 8, kind: input, shape index: {}]   ;;  %s4955_s9 = inlined_call_operand.vmem [shape: f32[20,4], index: 9, kind: output, shape index: {}]  }
   0x1   :  { %15 = vsyncpa [#allocation6], 0  ;;  %s4313_s30 = smov [#allocation5]   ;;  %s4314_s11 = smov [#allocation3]  }
   0x2   :  { %s39_s10 = sshll.u32 %s4313_s30, 4  ;;  %s25_s12 = sshll.u32 %s4314_s11, 4  ;;  %s40_s10 = int_to_ptr.vmem [resolvable:$true] %s39_s10  ;;  %s4373_s12 = int_to_ptr.vmem [resolvable:$true] %s25_s12 }
   0x3   :  { %s4243_s15 = scalar_lea.hbm %s4950_s4, 512 }
   0x4   :  { %p4244_p0 = scmp.ne.s32.totalorder %s4950_s4, %s4243_s15  ;;  %p4247_p1 = scmp.lt.u32.totalorder %s4243_s15, %s4950_s4 }
   0x6   :  { %p4249_p2 = pnand %p4247_p1, %p4244_p0 }
   0x8   :  { %4252 = shalt.err (!%p4249_p2)
}
   0x9   :  { %s4253_s20 = scalar_lea.vmem %s40_s10, 512  ;;  %p4258_p4 = scmp.lt.s32.totalorder %s40_s10, %s40_s10 }
   0xa   :  { %p4254_p3 = scmp.ne.s32.totalorder %s40_s10, %s4253_s20  ;;  %p4259_p5 = scmp.lt.s32.totalorder %s4253_s20, %s4253_s20 }
   0xc   :  { %p4260_p6 = por %p4259_p5, %p4258_p4 }
   0xe   :  { %p4261_p7 = pnand %p4260_p6, %p4254_p3 }
  0x10   :  { %4264 = shalt.err (!%p4261_p7)
}
  0x11   :  { %s4315_s21 = smov 128   ;;  %s4316_s22 = smov 8  }
  0x12   :  { %45 = dma.hbm_to_vmem [thread:$0]  %s4950_s4, 512, %s40_s10, [#allocation6], %s4315_s21, %s4315_s21, %s4316_s22  }
  0x13   :  { %s4265_s27 = scalar_lea.hbm %s4948_s2, 512 }
  0x14   :  { %p4266_p8 = scmp.ne.s32.totalorder %s4948_s2, %s4265_s27  ;;  %p4269_p9 = scmp.lt.u32.totalorder %s4265_s27, %s4948_s2 }
  0x16   :  { %p4271_p10 = pnand %p4269_p9, %p4266_p8 }
  0x18   :  { %4274 = shalt.err (!%p4271_p10)
}
  0x19   :  { %s4275_s13 = scalar_lea.vmem %s4373_s12, 512  ;;  %p4280_p12 = scmp.lt.s32.totalorder %s4373_s12, %s4373_s12 }
  0x1a   :  { %p4276_p11 = scmp.ne.s32.totalorder %s4373_s12, %s4275_s13  ;;  %p4281_p13 = scmp.lt.s32.totalorder %s4275_s13, %s4275_s13 }
  0x1c   :  { %p4282_p0 = por %p4281_p13, %p4280_p12 }
  0x1e   :  { %p4283_p1 = pnand %p4282_p0, %p4276_p11 }
  0x20   :  { %4286 = shalt.err (!%p4283_p1)
}
  0x21   :  { %31 = dma.hbm_to_vmem [thread:$0]  %s4948_s2, 512, %s4373_s12, [#allocation4], %s4315_s21, %s4315_s21, %s4316_s22  }
  0x22   :  { %s4317_s14 = smov [#allocation7]   ;;  %s4287_s18 = scalar_lea.hbm %s4951_s5, 512 }
  0x23   :  { %s51_s15 = sshll.u32 %s4317_s14, 4  ;;  %p4288_p2 = scmp.ne.s32.totalorder %s4951_s5, %s4287_s18  ;;  %s52_s15 = int_to_ptr.vmem [resolvable:$true] %s51_s15 }
  0x24   :  { %p4291_p3 = scmp.lt.u32.totalorder %s4287_s18, %s4951_s5 }
  0x26   :  { %p4293_p4 = pnand %p4291_p3, %p4288_p2 }
  0x28   :  { %4296 = shalt.err (!%p4293_p4)
}
  0x29   :  { %s4297_s25 = scalar_lea.vmem %s52_s15, 512  ;;  %p4302_p6 = scmp.lt.s32.totalorder %s52_s15, %s52_s15 }
  0x2a   :  { %p4298_p5 = scmp.ne.s32.totalorder %s52_s15, %s4297_s25  ;;  %p4303_p7 = scmp.lt.s32.totalorder %s4297_s25, %s4297_s25 }
  0x2c   :  { %p4304_p8 = por %p4303_p7, %p4302_p6 }
  0x2e   :  { %p4305_p9 = pnand %p4304_p8, %p4298_p5 }
  0x30   :  { %4308 = shalt.err (!%p4305_p9)
}
  0x31   :  { %57 = dma.hbm_to_vmem [thread:$0]  %s4951_s5, 512, %s52_s15, [#allocation6], %s4315_s21, %s4315_s21, %s4316_s22  }
  0x32   :  { %4309 = dma.done.wait [#allocation4], 512  }
  0x33   :  { %4310 = vsyncadd [#allocation4], 4294966784 }
  0x34   :  { %4311 = dma.done.wait [#allocation6], 1024  }
  0x35   :  { %4312 = vsyncadd [#allocation6], 4294966272  ;;  %v4318_v0 = vmov 0.0|0.0   ;;  %vm4319_vm0 = vmmov 0   ;;  %v4320_v1 = vmov 0.0   ;;  %vm102_vm1 = vcmask 1043456  }
  0x36   :  { %3910 = vmatprep.subr.bf16.mxu1 %v4318_v0  ;;  %3545 = vmatprep.mubr.msk.f32.mxu1 %vm4319_vm0, %v4320_v1  ;;  %vm95_vm2 = vcmask 31744   ;;  %v78_v2 = vld [vmem:[#allocation3] sm:$0xff]  ;;  %v79_v3 = vld [vmem:[#allocation3 + $0x8] sm:$0xff]  ;;  %v73_v4 = vld [vmem:[%s4947_s1] sm:$0xf]  ;;  %s4321_s30 = smov 64  }
  0x37   :  { %v4431_v5 = vpack.c.bf16 %v79_v3, %v78_v2  ;;  %3532 = vmatprep.subr.msk.mxu0 %vm102_vm1, %v73_v4  ;;  %v93_v6 = vld [vmem:[%s4946_s0] sm:$0xff]  ;;  %v81_v8 = vld [vmem:[#allocation3 + $0x18] sm:$0xff]  ;;  %s4322_s11 = smov 32   ;;  %v82_v28 = vld [vmem:[#allocation7] sm:$0xff]  ;;  %vm181_vm3 = vcmask 261120   ;;  %vm463_vm4 = vcmask 254976  }
  0x38   :  { %v80_v7 = vld [vmem:[#allocation3 + $0x10] sm:$0xff]  ;;  %3533 = vmatpush3.msk.msra.mxu0 %vm102_vm1, %v73_v4  ;;  %3534 = vmatprep.mubr.msk.f32.mxu0 %vm95_vm2, %v93_v6  ;;  %v94_v9 = vld [vmem:[%s4946_s0 + $0x8] sm:$0xff]  ;;  %v83_v29 = vld [vmem:[#allocation7 + $0x8] sm:$0xff]  ;;  %vm2899_vm5 = vcmask 25600  }
  0x39   :  { %3912 = vmatpush3.bf16.msra.mxu1 %v4431_v5  ;;  %v4443_v10 = vpack.c.bf16 %v81_v8, %v80_v7  ;;  %3535 = vmatmul.mubr.msk.f32.vlgmr.msra.gmra.mrb[0].mxu0 %vm95_vm2, %v94_v9  ;;  %v4462_v13 = vld [vmem:[%s4949_s3] ss:$0 sm:$0xff]  ;;  %v4471_v31 = vpack.c.bf16 %v83_v29, %v82_v28  ;;  %v85_v32 = vld [vmem:[#allocation7 + $0x18] sm:$0xff]  ;;  %v74_v33 = vld [vmem:[#allocation5] sm:$0xff] }
  0x3a   :  { %3913 = vmatprep.subr.bf16.mxu1 %v4318_v0  ;;  %3916 = vmatprep.subr.bf16.mxu0 %v4318_v0  ;;  %v84_v30 = vld [vmem:[#allocation7 + $0x10] sm:$0xff]  ;;  %v75_v34 = vld [vmem:[#allocation5 + $0x8] sm:$0xff]  ;;  %v77_v37 = vld [vmem:[#allocation5 + $0x18] sm:$0xff] }
  0x3b   :  { %3556 = vmatprep.mubr.msk.f32.mxu0 %vm4319_vm0, %v4320_v1  ;;  %v4473_v35 = vpack.c.bf16 %v75_v34, %v74_v33  ;;  %v76_v36 = vld [vmem:[#allocation5 + $0x10] sm:$0xff]  ;;  %3918 = vmatpush3.bf16.msra.mxu0 %v4471_v31  ;;  %v4476_v38 = vpack.c.bf16 %v85_v32, %v84_v30 }
  0x3c   :  { %3919 = vmatprep.subr.bf16.mxu0 %v4318_v0  ;;  %v4480_v39 = vpack.c.bf16 %v77_v37, %v76_v36  ;;  %v4513_v46 = vld [vmem:[%s4952_s6] ss:$0 sm:$0xff] }
  0x3d   :  { %3915 = vmatpush3.bf16.msra.mxu1 %v4443_v10 }
  0x3e   :  { %3922 = vmatprep.subr.bf16.mxu1 %v4318_v0 }
  0x3f   :  { %3921 = vmatpush3.bf16.msra.mxu0 %v4476_v38 }
  0x40   :  { %3546 = vmatmul.mubr.f32.vlgmr.msra.gmra.mrb[0].mxu1 %v4320_v1  ;;  %3928 = vmatprep.subr.bf16.mxu0 %v4318_v0 }
  0x41   :  { %3567 = vmatprep.mubr.msk.f32.mxu1 %vm4319_vm0, %v4320_v1  ;;  %3924 = vmatpush3.bf16.msra.mxu1 %v4473_v35 }
  0x42   :  { %3925 = vmatprep.subr.bf16.mxu1 %v4318_v0  ;;  %3557 = vmatmul.mubr.f32.vlgmr.msra.gmra.mrb[2].mxu0 %v4320_v1 }
  0x43   :  { %3930 = vmatpush3.bf16.msra.mxu0 %v4431_v5  ;;  %3578 = vmatprep.mubr.msk.f32.mxu0 %vm4319_vm0, %v4320_v1 }
  0x44   :  { %3931 = vmatprep.subr.bf16.mxu0 %v4318_v0 }
  0x45   :  { %3927 = vmatpush3.bf16.msra.mxu1 %v4480_v39 }
  0x46   :  { %3934 = vmatprep.subr.bf16.mxu1 %v4318_v0 }
  0x47   :  { %3933 = vmatpush3.bf16.msra.mxu0 %v4443_v10 }
  0x48   :  { %3940 = vmatprep.subr.bf16.mxu0 %v4318_v0 }
 0x10c   :  { %v4455_v11 = vpop.f32.mrb[0].mxu0 }
 0x10d   :  { %v4457_v12 = vpop.f32.mrb[1].mxu0 }
 0x113   :  { %v251_v14 = vpop.f32.mrb[0].mxu1 }
 0x114   :  { %v255_v15 = vadd.f32 %v251_v14, %v4457_v12  ;;  %v3547_v16 = vpop.f32.mrb[1].mxu1 }
 0x115   :  { %v351_v43 = vpop.f32.mrb[2].mxu0 }
 0x116   :  { %v262_v17 = vadd.f32 %v4462_v13, %v255_v15  ;;  %v3558_v44 = vpop.f32.mrb[3].mxu0 }
 0x118   :  { %4120 = vtanh.f32 %v262_v17  ;;  %v263_v19 = vmul.f32 0.5, %v262_v17 }
 0x11a   :  { %4122 = vtanh.f32 %v263_v19 }
 0x122   :  { %v4121_v18 = vpop.eup %4120 }
 0x123   :  { %270 = vrot.lane.b32.xlu0 %v4121_v18, %s4321_s30 }
 0x124   :  { %v4123_v20 = vpop.eup %4122 }
 0x125   :  { %v265_v21 = vmul.f32 0.5, %v4123_v20 }
 0x127   :  { %v266_v22 = vadd.f32 0.5, %v265_v21 }
 0x129   :  { %v268_v25 = vmul.f32 0.0, %v266_v22 }
 0x195   :  { %v271_v23 = vpop.permute.xlu0 %270 }
 0x196   :  { %v273_v24 = vmul.f32 %v271_v23, %v266_v22 }
 0x198   :  { %275 = vrot.lane.b32.xlu0 %v273_v24, %s4322_s11 }
 0x20a   :  { %v276_v26 = vpop.permute.xlu0 %275 }
 0x20b   :  { %v4468_v27 = vadd.f32 %v276_v26, %v268_v25 }
 0x20d   :  { %4124 = vtanh.f32 %v4468_v27  ;;  %v546_v14 = vrot.slane %v4468_v27, 6 }
 0x217   :  { %v4125_v40 = vpop.eup %4124 }
 0x218   :  { %281 = vrot.lane.b32.xlu1 %v4125_v40, %s4321_s30 }
 0x28a   :  { %v282_v41 = vpop.permute.xlu1 %281 }
 0x28b   :  { %v284_v42 = vmul.f32 %v282_v41, %v266_v22 }
 0x28d   :  { %356 = vrot.lane.b32.xlu1 %v284_v42, %s4322_s11 }
 0x2ff   :  { %v357_v45 = vpop.permute.xlu1 %356 }
 0x300   :  { %3568 = vmatmul.mubr.msk.f32.vlgmr.msra.gmra.mrb[2].mxu1 %vm181_vm3, %v357_v45  ;;  %3579 = vmatmul.mubr.msk.f32.vlgmr.msra.gmra.mrb[4].mxu0 %vm181_vm3, %v357_v45 }
 0x301   :  { %3936 = vmatpush3.bf16.msra.mxu1 %v4471_v31  ;;  %3942 = vmatpush3.bf16.msra.mxu0 %v4473_v35 }
 0x302   :  { %3937 = vmatprep.subr.bf16.mxu1 %v4318_v0  ;;  %3589 = vmatprep.mubr.msk.f32.mxu1 %vm4319_vm0, %v4320_v1 }
 0x303   :  { %3943 = vmatprep.subr.bf16.mxu0 %v4318_v0  ;;  %3600 = vmatprep.mubr.msk.f32.mxu0 %vm4319_vm0, %v4320_v1 }
 0x305   :  { %3939 = vmatpush3.bf16.msra.mxu1 %v4476_v38  ;;  %3945 = vmatpush3.bf16.msra.mxu0 %v4480_v39 }
 0x306   :  { %3946 = vmatprep.subr.bf16.mxu1 %v4318_v0  ;;  %3952 = vmatprep.subr.bf16.mxu0 %v4318_v0 }
 0x3d3   :  { %v426_v47 = vpop.f32.mrb[2].mxu1  ;;  %v531_v48 = vpop.f32.mrb[4].mxu0 }
 0x3d4   :  { %v427_v49 = vadd.f32 %v426_v47, %v351_v43  ;;  %v536_v50 = vrot.slane %v531_v48, 6  ;;  %v3569_v51 = vpop.f32.mrb[3].mxu1  ;;  %v3580_v52 = vpop.f32.mrb[5].mxu0 }
 0x3d6   :  { %v436_v53 = vadd.f32 %v4513_v46, %v427_v49  ;;  %v538_v54 = vadd.f32 %v536_v50, %v4457_v12 }
 0x3d8   :  { %4126 = vtanh.f32 %v436_v53  ;;  %v539_v55 = vadd.f32 %v4462_v13, %v538_v54  ;;  %v437_v58 = vmul.f32 0.5, %v436_v53 }
 0x3da   :  { %4128 = vtanh.f32 %v539_v55  ;;  %v540_v59 = vmul.f32 0.5, %v539_v55 }
 0x3db   :  { %4130 = vtanh.f32 %v437_v58 }
 0x3dc   :  { %4132 = vtanh.f32 %v540_v59 }
 0x3e2   :  { %v4127_v56 = vpop.eup %4126 }
 0x3e3   :  { %444 = vrot.lane.b32.xlu0 %v4127_v56, %s4321_s30 }
 0x3e4   :  { %v4129_v57 = vpop.eup %4128 }
 0x3e5   :  { %550 = vrot.lane.b32.xlu1 %v4129_v57, %s4321_s30  ;;  %v4131_v60 = vpop.eup %4130 }
 0x3e6   :  { %v4133_v61 = vpop.eup %4132  ;;  %v439_v62 = vmul.f32 0.5, %v4131_v60 }
 0x3e7   :  { %v542_v63 = vmul.f32 0.5, %v4133_v61 }
 0x3e8   :  { %v440_v2 = vadd.f32 0.5, %v439_v62 }
 0x3e9   :  { %v543_v6 = vadd.f32 0.5, %v542_v63 }
 0x3ea   :  { %v442_v9 = vmul.f32 0.0, %v440_v2 }
 0x3eb   :  { %v548_v17 = vmul.f32 %v546_v14, %v543_v6 }
 0x455   :  { %v445_v3 = vpop.permute.xlu0 %444 }
 0x456   :  { %v447_v4 = vmul.f32 %v445_v3, %v440_v2 }
 0x457   :  { %v551_v7 = vpop.permute.xlu1 %550 }
 0x458   :  { %449 = vrot.lane.b32.xlu0 %v447_v4, %s4322_s11  ;;  %v553_v8 = vmul.f32 %v551_v7, %v543_v6 }
 0x45a   :  { %555 = vrot.lane.b32.xlu1 %v553_v8, %s4322_s11 }
 0x4ca   :  { %v450_v15 = vpop.permute.xlu0 %449 }
 0x4cb   :  { %v4523_v16 = vadd.f32 %v450_v15, %v442_v9 }
 0x4cc   :  { %v556_v18 = vpop.permute.xlu1 %555 }
 0x4cd   :  { %4134 = vtanh.f32 %v4523_v16  ;;  %v4526_v19 = vadd.f32 %v556_v18, %v548_v17 }
 0x4cf   :  { %4136 = vtanh.f32 %v4526_v19  ;;  %v822_v62 = vrot.slane %v4526_v19, 6 }
 0x4d7   :  { %v4135_v20 = vpop.eup %4134 }
 0x4d8   :  { %455 = vrot.lane.b32.xlu0 %v4135_v20, %s4321_s30 }
 0x4d9   :  { %v4137_v21 = vpop.eup %4136 }
 0x4da   :  { %561 = vrot.lane.b32.xlu1 %v4137_v21, %s4321_s30 }
 0x54a   :  { %v456_v22 = vpop.permute.xlu0 %455 }
 0x54b   :  { %v458_v23 = vmul.f32 %v456_v22, %v440_v2 }
 0x54c   :  { %v562_v24 = vpop.permute.xlu1 %561 }
 0x54d   :  { %460 = vrot.lane.b32.xlu0 %v458_v23, %s4322_s11  ;;  %v564_v25 = vmul.f32 %v562_v24, %v543_v6 }
 0x54f   :  { %v638_v26 = vrot.slane %v564_v25, 2 }
 0x551   :  { %639 = vrot.lane.b32.xlu1 %v638_v26, %s4322_s11 }
 0x5bf   :  { %v461_v27 = vpop.permute.xlu0 %460 }
 0x5c0   :  { %464 = vst.msk [vmem:[#allocation2] sm:$0x3] %vm463_vm4, %v461_v27  ;;  %3590 = vmatmul.mubr.msk.f32.vlgmr.msra.gmra.mrb[4].mxu1 %vm181_vm3, %v461_v27 }
 0x5c1   :  { %3948 = vmatpush3.bf16.msra.mxu1 %v4431_v5  ;;  %3611 = vmatprep.mubr.msk.f32.mxu1 %vm4319_vm0, %v4320_v1 }
 0x5c2   :  { %3949 = vmatprep.subr.bf16.mxu1 %v4318_v0 }
 0x5c3   :  { %v640_v28 = vpop.permute.xlu1 %639 }
 0x5c4   :  { %3601 = vmatmul.mubr.msk.f32.vlgmr.msra.gmra.mrb[6].mxu0 %vm181_vm3, %v640_v28 }
 0x5c5   :  { %3951 = vmatpush3.bf16.msra.mxu1 %v4443_v10  ;;  %3954 = vmatpush3.bf16.msra.mxu0 %v4471_v31 }
 0x5c6   :  { %3622 = vmatprep.mubr.msk.f32.mxu0 %vm4319_vm0, %v4320_v1  ;;  %3955 = vmatprep.subr.bf16.mxu0 %v4318_v0 }
 0x5c7   :  { %3958 = vmatprep.subr.bf16.mxu1 %v4318_v0 }
 0x5c8   :  { %3612 = vmatmul.mubr.msk.f32.vlgmr.msra.gmra.mrb[6].mxu1 %vm181_vm3, %v640_v28 }
 0x5c9   :  { %3960 = vmatpush3.bf16.msra.mxu1 %v4473_v35  ;;  %3633 = vmatprep.mubr.msk.f32.mxu1 %vm4319_vm0, %v4320_v1 }
 0x5ca   :  { %3957 = vmatpush3.bf16.msra.mxu0 %v4476_v38  ;;  %3961 = vmatprep.subr.bf16.mxu1 %v4318_v0 }
 0x5cb   :  { %3964 = vmatprep.subr.bf16.mxu0 %v4318_v0 }
 0x5cd   :  { %3963 = vmatpush3.bf16.msra.mxu1 %v4480_v39 }
 0x5ce   :  { %3970 = vmatprep.subr.bf16.mxu1 %v4318_v0 }
 0x693   :  { %v633_v29 = vpop.f32.mrb[4].mxu1 }
 0x694   :  { %v3591_v30 = vpop.f32.mrb[5].mxu1 }
 0x697   :  { %v709_v32 = vpop.f32.mrb[6].mxu0 }
 0x698   :  { %v710_v33 = vadd.f32 %v709_v32, %v633_v29  ;;  %v3602_v34 = vpop.f32.mrb[7].mxu0 }
 0x69a   :  { %v713_v36 = vadd.f32 %v4513_v46, %v710_v33 }
 0x69b   :  { %v807_v37 = vpop.f32.mrb[6].mxu1 }
 0x69c   :  { %v812_v40 = vrot.slane %v807_v37, 4  ;;  %v3613_v41 = vpop.f32.mrb[7].mxu1  ;;  %4138 = vtanh.f32 %v713_v36  ;;  %v714_v47 = vmul.f32 0.5, %v713_v36 }
 0x69e   :  { %v814_v42 = vadd.f32 %v812_v40, %v4457_v12 }
 0x6a0   :  { %v815_v43 = vadd.f32 %v4462_v13, %v814_v42 }
 0x6a2   :  { %4140 = vtanh.f32 %v815_v43  ;;  %v816_v48 = vmul.f32 0.5, %v815_v43 }
 0x6a3   :  { %4142 = vtanh.f32 %v714_v47 }
 0x6a4   :  { %4144 = vtanh.f32 %v816_v48 }
 0x6a6   :  { %v4139_v44 = vpop.eup %4138 }
 0x6a7   :  { %721 = vrot.lane.b32.xlu0 %v4139_v44, %s4321_s30 }
 0x6ac   :  { %v4141_v45 = vpop.eup %4140 }
 0x6ad   :  { %826 = vrot.lane.b32.xlu1 %v4141_v45, %s4321_s30  ;;  %v4143_v49 = vpop.eup %4142 }
 0x6ae   :  { %v716_v50 = vmul.f32 0.5, %v4143_v49  ;;  %v4145_v51 = vpop.eup %4144 }
 0x6af   :  { %v818_v54 = vmul.f32 0.5, %v4145_v51 }
 0x6b0   :  { %v717_v52 = vadd.f32 0.5, %v716_v50 }
 0x6b1   :  { %v819_v56 = vadd.f32 0.5, %v818_v54 }
 0x6b2   :  { %v719_v59 = vmul.f32 %v717_v52, %v4523_v16 }
 0x6b3   :  { %v824_v63 = vmul.f32 %v822_v62, %v819_v56 }
 0x719   :  { %v722_v53 = vpop.permute.xlu0 %721 }
 0x71a   :  { %v724_v55 = vmul.f32 %v722_v53, %v717_v52 }
 0x71c   :  { %726 = vrot.lane.b32.xlu0 %v724_v55, %s4322_s11 }
 0x71f   :  { %v827_v57 = vpop.permute.xlu1 %826 }
 0x720   :  { %v829_v58 = vmul.f32 %v827_v57, %v819_v56 }
 0x722   :  { %831 = vrot.lane.b32.xlu1 %v829_v58, %s4322_s11 }
 0x78e   :  { %v727_v60 = vpop.permute.xlu0 %726 }
 0x78f   :  { %v4563_v61 = vadd.f32 %v727_v60, %v719_v59 }
 0x791   :  { %4146 = vtanh.f32 %v4563_v61 }
 0x794   :  { %v832_v2 = vpop.permute.xlu1 %831 }
 0x795   :  { %v4567_v3 = vadd.f32 %v832_v2, %v824_v63 }
 0x797   :  { %4148 = vtanh.f32 %v4567_v3  ;;  %v1098_v48 = vrot.slane %v4567_v3, 6 }
 0x79b   :  { %v4147_v4 = vpop.eup %4146 }
 0x79c   :  { %732 = vrot.lane.b32.xlu0 %v4147_v4, %s4321_s30 }
 0x7a1   :  { %v4149_v6 = vpop.eup %4148 }
 0x7a2   :  { %837 = vrot.lane.b32.xlu1 %v4149_v6, %s4321_s30 }
 0x80e   :  { %v733_v7 = vpop.permute.xlu0 %732 }
 0x80f   :  { %v735_v8 = vmul.f32 %v733_v7, %v717_v52 }
 0x811   :  { %737 = vrot.lane.b32.xlu0 %v735_v8, %s4322_s11 }
 0x814   :  { %v838_v9 = vpop.permute.xlu1 %837 }
 0x815   :  { %v840_v14 = vmul.f32 %v838_v9, %v819_v56 }
 0x817   :  { %v914_v15 = vrot.slane %v840_v14, 4 }
 0x819   :  { %915 = vrot.lane.b32.xlu1 %v914_v15, %s4322_s11 }
 0x883   :  { %v738_v16 = vpop.permute.xlu0 %737 }
 0x884   :  { %740 = vst.msk [vmem:[#allocation2 + $0x2] sm:$0x3] %vm463_vm4, %v738_v16  ;;  %3623 = vmatmul.mubr.msk.f32.vlgmr.msra.gmra.mrb[8].mxu0 %vm181_vm3, %v738_v16 }
 0x885   :  { %3966 = vmatpush3.bf16.msra.mxu0 %v4431_v5  ;;  %3644 = vmatprep.mubr.msk.f32.mxu0 %vm4319_vm0, %v4320_v1 }
 0x886   :  { %3967 = vmatprep.subr.bf16.mxu0 %v4318_v0 }
 0x889   :  { %3969 = vmatpush3.bf16.msra.mxu0 %v4443_v10 }
 0x88a   :  { %3976 = vmatprep.subr.bf16.mxu0 %v4318_v0 }
 0x88b   :  { %v916_v17 = vpop.permute.xlu1 %915 }
 0x88c   :  { %3634 = vmatmul.mubr.msk.f32.vlgmr.msra.gmra.mrb[8].mxu1 %vm181_vm3, %v916_v17  ;;  %3645 = vmatmul.mubr.msk.f32.vlgmr.msra.gmra.mrb[10].mxu0 %vm181_vm3, %v916_v17 }
 0x88d   :  { %3972 = vmatpush3.bf16.msra.mxu1 %v4471_v31  ;;  %3978 = vmatpush3.bf16.msra.mxu0 %v4473_v35 }
 0x88e   :  { %3973 = vmatprep.subr.bf16.mxu1 %v4318_v0  ;;  %3655 = vmatprep.mubr.msk.f32.mxu1 %vm4319_vm0, %v4320_v1 }
 0x88f   :  { %3979 = vmatprep.subr.bf16.mxu0 %v4318_v0  ;;  %3666 = vmatprep.mubr.msk.f32.mxu0 %vm4319_vm0, %v4320_v1 }
 0x891   :  { %3975 = vmatpush3.bf16.msra.mxu1 %v4476_v38  ;;  %3981 = vmatpush3.bf16.msra.mxu0 %v4480_v39 }
 0x892   :  { %3982 = vmatprep.subr.bf16.mxu1 %v4318_v0  ;;  %3988 = vmatprep.subr.bf16.mxu0 %v4318_v0 }
 0x957   :  { %v909_v18 = vpop.f32.mrb[8].mxu0 }
 0x958   :  { %v3624_v19 = vpop.f32.mrb[9].mxu0 }
 0x95f   :  { %v985_v20 = vpop.f32.mrb[8].mxu1  ;;  %v1083_v22 = vpop.f32.mrb[10].mxu0 }
 0x960   :  { %v986_v21 = vadd.f32 %v985_v20, %v909_v18  ;;  %v3635_v23 = vpop.f32.mrb[9].mxu1  ;;  %v1088_v24 = vrot.slane %v1083_v22, 2  ;;  %v3646_v25 = vpop.f32.mrb[11].mxu0 }
 0x962   :  { %v989_v26 = vadd.f32 %v4513_v46, %v986_v21  ;;  %v1090_v27 = vadd.f32 %v1088_v24, %v4457_v12 }
 0x964   :  { %4150 = vtanh.f32 %v989_v26  ;;  %v1091_v28 = vadd.f32 %v4462_v13, %v1090_v27  ;;  %v990_v32 = vmul.f32 0.5, %v989_v26 }
 0x966   :  { %4152 = vtanh.f32 %v1091_v28  ;;  %v1092_v33 = vmul.f32 0.5, %v1091_v28 }
 0x967   :  { %4154 = vtanh.f32 %v990_v32 }
 0x968   :  { %4156 = vtanh.f32 %v1092_v33 }
 0x96e   :  { %v4151_v29 = vpop.eup %4150 }
 0x96f   :  { %997 = vrot.lane.b32.xlu1 %v4151_v29, %s4321_s30 }
 0x970   :  { %v4153_v30 = vpop.eup %4152 }
 0x971   :  { %1102 = vrot.lane.b32.xlu0 %v4153_v30, %s4321_s30  ;;  %v4155_v34 = vpop.eup %4154 }
 0x972   :  { %v4157_v36 = vpop.eup %4156  ;;  %v992_v37 = vmul.f32 0.5, %v4155_v34 }
 0x973   :  { %v1094_v40 = vmul.f32 0.5, %v4157_v36 }
 0x974   :  { %v993_v41 = vadd.f32 0.5, %v992_v37 }
 0x975   :  { %v1095_v43 = vadd.f32 0.5, %v1094_v40 }
 0x976   :  { %v995_v47 = vmul.f32 %v993_v41, %v4563_v61 }
 0x977   :  { %v1100_v51 = vmul.f32 %v1098_v48, %v1095_v43 }
 0x9e1   :  { %v998_v12 = vpop.permute.xlu1 %997 }
 0x9e2   :  { %v1000_v42 = vmul.f32 %v998_v12, %v993_v41 }
 0x9e3   :  { %v1103_v44 = vpop.permute.xlu0 %1102 }
 0x9e4   :  { %1002 = vrot.lane.b32.xlu1 %v1000_v42, %s4322_s11  ;;  %v1105_v45 = vmul.f32 %v1103_v44, %v1095_v43 }
 0x9e6   :  { %1107 = vrot.lane.b32.xlu0 %v1105_v45, %s4322_s11 }
 0xa56   :  { %v1003_v49 = vpop.permute.xlu1 %1002 }
 0xa57   :  { %v4605_v50 = vadd.f32 %v1003_v49, %v995_v47 }
 0xa58   :  { %v1108_v52 = vpop.permute.xlu0 %1107 }
 0xa59   :  { %4158 = vtanh.f32 %v4605_v50  ;;  %v4608_v53 = vadd.f32 %v1108_v52, %v1100_v51 }
 0xa5b   :  { %4160 = vtanh.f32 %v4608_v53  ;;  %v1371_v32 = vrot.slane %v4608_v53, 6 }
 0xa63   :  { %v4159_v54 = vpop.eup %4158 }
 0xa64   :  { %1008 = vrot.lane.b32.xlu1 %v4159_v54, %s4321_s30 }
 0xa65   :  { %v4161_v55 = vpop.eup %4160 }
 0xa66   :  { %1113 = vrot.lane.b32.xlu0 %v4161_v55, %s4321_s30 }
 0xad6   :  { %v1009_v56 = vpop.permute.xlu1 %1008 }
 0xad7   :  { %v1011_v57 = vmul.f32 %v1009_v56, %v993_v41 }
 0xad8   :  { %v1114_v58 = vpop.permute.xlu0 %1113 }
 0xad9   :  { %1013 = vrot.lane.b32.xlu0 %v1011_v57, %s4322_s11  ;;  %v1116_v59 = vmul.f32 %v1114_v58, %v1095_v43 }
 0xadb   :  { %v1190_v60 = vrot.slane %v1116_v59, 6 }
 0xadd   :  { %1191 = vrot.lane.b32.xlu1 %v1190_v60, %s4322_s11 }
 0xb4b   :  { %v1014_v61 = vpop.permute.xlu0 %1013 }
 0xb4c   :  { %1016 = vst.msk [vmem:[#allocation2 + $0x4] sm:$0x3] %vm463_vm4, %v1014_v61  ;;  %3656 = vmatmul.mubr.msk.f32.vlgmr.msra.gmra.mrb[10].mxu1 %vm181_vm3, %v1014_v61 }
 0xb4d   :  { %3984 = vmatpush3.bf16.msra.mxu1 %v4431_v5  ;;  %3677 = vmatprep.mubr.msk.f32.mxu1 %vm4319_vm0, %v4320_v1 }
 0xb4e   :  { %3985 = vmatprep.subr.bf16.mxu1 %v4318_v0 }
 0xb4f   :  { %v1192_v62 = vpop.permute.xlu1 %1191 }
 0xb50   :  { %3667 = vmatmul.mubr.msk.f32.vlgmr.msra.gmra.mrb[12].mxu0 %vm181_vm3, %v1192_v62 }
 0xb51   :  { %3987 = vmatpush3.bf16.msra.mxu1 %v4443_v10  ;;  %3990 = vmatpush3.bf16.msra.mxu0 %v4471_v31 }
 0xb52   :  { %3994 = vmatprep.subr.bf16.mxu1 %v4318_v0  ;;  %3991 = vmatprep.subr.bf16.mxu0 %v4318_v0 }
 0xb53   :  { %3688 = vmatprep.mubr.msk.f32.mxu0 %vm4319_vm0, %v4320_v1 }
 0xb54   :  { %3678 = vmatmul.mubr.msk.f32.vlgmr.msra.gmra.mrb[12].mxu1 %vm181_vm3, %v1192_v62 }
 0xb55   :  { %3996 = vmatpush3.bf16.msra.mxu1 %v4473_v35  ;;  %3699 = vmatprep.mubr.msk.f32.mxu1 %vm4319_vm0, %v4320_v1 }
 0xb56   :  { %3993 = vmatpush3.bf16.msra.mxu0 %v4476_v38  ;;  %3997 = vmatprep.subr.bf16.mxu1 %v4318_v0 }
 0xb57   :  { %4000 = vmatprep.subr.bf16.mxu0 %v4318_v0 }
 0xb59   :  { %3999 = vmatpush3.bf16.msra.mxu1 %v4480_v39 }
 0xb5a   :  { %4006 = vmatprep.subr.bf16.mxu1 %v4318_v0 }
 0xc1f   :  { %v1185_v63 = vpop.f32.mrb[10].mxu1 }
 0xc20   :  { %v3657_v2 = vpop.f32.mrb[11].mxu1 }
 0xc23   :  { %v1261_v3 = vpop.f32.mrb[12].mxu0 }
 0xc24   :  { %v1262_v4 = vadd.f32 %v1261_v3, %v1185_v63  ;;  %v3668_v6 = vpop.f32.mrb[13].mxu0 }
 0xc26   :  { %v1265_v7 = vadd.f32 %v4513_v46, %v1262_v4 }
 0xc27   :  { %v1359_v8 = vpop.f32.mrb[12].mxu1 }
 0xc28   :  { %v1363_v9 = vadd.f32 %v4455_v11, %v1359_v8  ;;  %v3679_v14 = vpop.f32.mrb[13].mxu1  ;;  %4162 = vtanh.f32 %v1265_v7  ;;  %v1266_v18 = vmul.f32 0.5, %v1265_v7 }
 0xc2a   :  { %v1364_v15 = vadd.f32 %v4462_v13, %v1363_v9 }
 0xc2c   :  { %4164 = vtanh.f32 %v1364_v15  ;;  %v1365_v19 = vmul.f32 0.5, %v1364_v15 }
 0xc2d   :  { %4166 = vtanh.f32 %v1266_v18 }
 0xc2e   :  { %4168 = vtanh.f32 %v1365_v19 }
 0xc32   :  { %v4163_v16 = vpop.eup %4162 }
 0xc33   :  { %1273 = vrot.lane.b32.xlu0 %v4163_v16, %s4321_s30 }
 0xc36   :  { %v4165_v17 = vpop.eup %4164 }
 0xc37   :  { %1375 = vrot.lane.b32.xlu1 %v4165_v17, %s4321_s30  ;;  %v4167_v20 = vpop.eup %4166 }
 0xc38   :  { %v4169_v21 = vpop.eup %4168  ;;  %v1268_v22 = vmul.f32 0.5, %v4167_v20 }
 0xc39   :  { %v1367_v23 = vmul.f32 0.5, %v4169_v21 }
 0xc3a   :  { %v1269_v24 = vadd.f32 0.5, %v1268_v22 }
 0xc3b   :  { %v1368_v27 = vadd.f32 0.5, %v1367_v23 }
 0xc3c   :  { %v1271_v30 = vmul.f32 %v1269_v24, %v4605_v50 }
 0xc3d   :  { %v1373_v36 = vmul.f32 %v1371_v32, %v1368_v27 }
 0xca5   :  { %v1274_v25 = vpop.permute.xlu0 %1273 }
 0xca6   :  { %v1276_v26 = vmul.f32 %v1274_v25, %v1269_v24 }
 0xca8   :  { %1278 = vrot.lane.b32.xlu0 %v1276_v26, %s4322_s11 }
 0xca9   :  { %v1376_v28 = vpop.permute.xlu1 %1375 }
 0xcaa   :  { %v1378_v29 = vmul.f32 %v1376_v28, %v1368_v27 }
 0xcac   :  { %1380 = vrot.lane.b32.xlu1 %v1378_v29, %s4322_s11 }
 0xd1a   :  { %v1279_v33 = vpop.permute.xlu0 %1278 }
 0xd1b   :  { %v4646_v34 = vadd.f32 %v1279_v33, %v1271_v30 }
 0xd1d   :  { %4170 = vtanh.f32 %v4646_v34 }
 0xd1e   :  { %v1381_v37 = vpop.permute.xlu1 %1380 }
 0xd1f   :  { %v4649_v40 = vadd.f32 %v1381_v37, %v1373_v36 }
 0xd21   :  { %4172 = vtanh.f32 %v4649_v40  ;;  %v1646_v20 = vrot.slane %v4649_v40, 6 }
 0xd27   :  { %v4171_v41 = vpop.eup %4170 }
 0xd28   :  { %1284 = vrot.lane.b32.xlu0 %v4171_v41, %s4321_s30 }
 0xd2b   :  { %v4173_v12 = vpop.eup %4172 }
 0xd2c   :  { %1386 = vrot.lane.b32.xlu1 %v4173_v12, %s4321_s30 }
 0xd9a   :  { %v1285_v42 = vpop.permute.xlu0 %1284 }
 0xd9b   :  { %v1287_v43 = vmul.f32 %v1285_v42, %v1269_v24 }
 0xd9d   :  { %1289 = vrot.lane.b32.xlu0 %v1287_v43, %s4322_s11 }
 0xd9e   :  { %v1387_v44 = vpop.permute.xlu1 %1386 }
 0xd9f   :  { %v1389_v45 = vmul.f32 %v1387_v44, %v1368_v27 }
 0xda1   :  { %1463 = vrot.lane.b32.xlu1 %v1389_v45, %s4322_s11 }
 0xe0f   :  { %v1290_v47 = vpop.permute.xlu0 %1289 }
 0xe10   :  { %1292 = vst.msk [vmem:[#allocation2 + $0x6] sm:$0x3] %vm463_vm4, %v1290_v47  ;;  %3689 = vmatmul.mubr.msk.f32.vlgmr.msra.gmra.mrb[14].mxu0 %vm181_vm3, %v1290_v47 }
 0xe11   :  { %4002 = vmatpush3.bf16.msra.mxu0 %v4431_v5  ;;  %3710 = vmatprep.mubr.msk.f32.mxu0 %vm4319_vm0, %v4320_v1 }
 0xe12   :  { %4003 = vmatprep.subr.bf16.mxu0 %v4318_v0 }
 0xe13   :  { %v1464_v48 = vpop.permute.xlu1 %1463 }
 0xe14   :  { %3700 = vmatmul.mubr.msk.f32.vlgmr.msra.gmra.mrb[14].mxu1 %vm181_vm3, %v1464_v48 }
 0xe15   :  { %4008 = vmatpush3.bf16.msra.mxu1 %v4471_v31  ;;  %3721 = vmatprep.mubr.msk.f32.mxu1 %vm4319_vm0, %v4320_v1 }
 0xe16   :  { %4005 = vmatpush3.bf16.msra.mxu0 %v4443_v10  ;;  %4009 = vmatprep.subr.bf16.mxu1 %v4318_v0 }
 0xe17   :  { %4012 = vmatprep.subr.bf16.mxu0 %v4318_v0 }
 0xe19   :  { %3711 = vmatmul.mubr.msk.f32.vlgmr.msra.gmra.mrb[16].mxu0 %vm181_vm3, %v1464_v48  ;;  %4011 = vmatpush3.bf16.msra.mxu1 %v4476_v38 }
 0xe1a   :  { %4018 = vmatprep.subr.bf16.mxu1 %v4318_v0  ;;  %4014 = vmatpush3.bf16.msra.mxu0 %v4473_v35 }
 0xe1b   :  { %4015 = vmatprep.subr.bf16.mxu0 %v4318_v0  ;;  %3732 = vmatprep.mubr.msk.f32.mxu0 %vm4319_vm0, %v4320_v1 }
 0xe1e   :  { %4017 = vmatpush3.bf16.msra.mxu0 %v4480_v39 }
 0xe1f   :  { %4024 = vmatprep.subr.bf16.mxu0 %v4318_v0 }
 0xee3   :  { %v1458_v49 = vpop.f32.mrb[14].mxu0 }
 0xee4   :  { %v3690_v50 = vpop.f32.mrb[15].mxu0 }
 0xee7   :  { %v1533_v51 = vpop.f32.mrb[14].mxu1 }
 0xee8   :  { %v1534_v52 = vadd.f32 %v1533_v51, %v1458_v49  ;;  %v3701_v53 = vpop.f32.mrb[15].mxu1 }
 0xeea   :  { %v1537_v54 = vadd.f32 %v4513_v46, %v1534_v52 }
 0xeec   :  { %4174 = vtanh.f32 %v1537_v54  ;;  %v1631_v55 = vpop.f32.mrb[16].mxu0  ;;  %v1538_v62 = vmul.f32 0.5, %v1537_v54 }
 0xeed   :  { %v1636_v56 = vrot.slane %v1631_v55, 6  ;;  %v3712_v57 = vpop.f32.mrb[17].mxu0 }
 0xeef   :  { %v1638_v58 = vadd.f32 %v4455_v11, %v1636_v56 }
 0xef1   :  { %v1639_v59 = vadd.f32 %v4462_v13, %v1638_v58 }
 0xef3   :  { %4176 = vtanh.f32 %v1639_v59  ;;  %v1640_v63 = vmul.f32 0.5, %v1639_v59 }
 0xef4   :  { %4178 = vtanh.f32 %v1538_v62 }
 0xef5   :  { %4180 = vtanh.f32 %v1640_v63 }
 0xef6   :  { %v4175_v60 = vpop.eup %4174 }
 0xef7   :  { %1545 = vrot.lane.b32.xlu0 %v4175_v60, %s4321_s30 }
 0xefd   :  { %v4177_v61 = vpop.eup %4176 }
 0xefe   :  { %1650 = vrot.lane.b32.xlu1 %v4177_v61, %s4321_s30  ;;  %v4179_v2 = vpop.eup %4178 }
 0xeff   :  { %v1540_v3 = vmul.f32 0.5, %v4179_v2  ;;  %v4181_v4 = vpop.eup %4180 }
 0xf00   :  { %v1642_v9 = vmul.f32 0.5, %v4181_v4 }
 0xf01   :  { %v1541_v6 = vadd.f32 0.5, %v1540_v3 }
 0xf02   :  { %v1643_v14 = vadd.f32 0.5, %v1642_v9 }
 0xf03   :  { %v1543_v17 = vmul.f32 %v1541_v6, %v4646_v34 }
 0xf04   :  { %v1648_v21 = vmul.f32 %v1646_v20, %v1643_v14 }
 0xf69   :  { %v1546_v7 = vpop.permute.xlu0 %1545 }
 0xf6a   :  { %v1548_v8 = vmul.f32 %v1546_v7, %v1541_v6 }
 0xf6c   :  { %1550 = vrot.lane.b32.xlu0 %v1548_v8, %s4322_s11 }
 0xf70   :  { %v1651_v15 = vpop.permute.xlu1 %1650 }
 0xf71   :  { %v1653_v16 = vmul.f32 %v1651_v15, %v1643_v14 }
 0xf73   :  { %1655 = vrot.lane.b32.xlu1 %v1653_v16, %s4322_s11 }
 0xfde   :  { %v1551_v18 = vpop.permute.xlu0 %1550 }
 0xfdf   :  { %v4686_v19 = vadd.f32 %v1551_v18, %v1543_v17 }
 0xfe1   :  { %4182 = vtanh.f32 %v4686_v19 }
 0xfe5   :  { %v1656_v22 = vpop.permute.xlu1 %1655 }
 0xfe6   :  { %v4690_v23 = vadd.f32 %v1656_v22, %v1648_v21 }
 0xfe8   :  { %4184 = vtanh.f32 %v4690_v23  ;;  %v1922_v62 = vrot.slane %v4690_v23, 6 }
 0xfeb   :  { %v4183_v24 = vpop.eup %4182 }
 0xfec   :  { %1556 = vrot.lane.b32.xlu0 %v4183_v24, %s4321_s30 }
 0xff2   :  { %v4185_v25 = vpop.eup %4184 }
 0xff3   :  { %1661 = vrot.lane.b32.xlu1 %v4185_v25, %s4321_s30 }
0x105e   :  { %v1557_v26 = vpop.permute.xlu0 %1556 }
0x105f   :  { %v1559_v27 = vmul.f32 %v1557_v26, %v1541_v6 }
0x1061   :  { %1561 = vrot.lane.b32.xlu0 %v1559_v27, %s4322_s11 }
0x1065   :  { %v1662_v28 = vpop.permute.xlu1 %1661 }
0x1066   :  { %v1664_v29 = vmul.f32 %v1662_v28, %v1643_v14 }
0x1068   :  { %v1738_v30 = vrot.slane %v1664_v29, 2 }
0x106a   :  { %1739 = vrot.lane.b32.xlu1 %v1738_v30, %s4322_s11  ;;  %v4764_v30 = vld [vmem:[%s4949_s3] ss:$0 sm:$0xff] }
0x10d3   :  { %v1562_v32 = vpop.permute.xlu0 %1561 }
0x10d4   :  { %1564 = vst.msk [vmem:[#allocation2 + $0x8] sm:$0x3] %vm463_vm4, %v1562_v32  ;;  %3722 = vmatmul.mubr.msk.f32.vlgmr.msra.gmra.mrb[16].mxu1 %vm181_vm3, %v1562_v32 }
0x10d5   :  { %4020 = vmatpush3.bf16.msra.mxu1 %v4431_v5  ;;  %3743 = vmatprep.mubr.msk.f32.mxu1 %vm4319_vm0, %v4320_v1 }
0x10d6   :  { %4021 = vmatprep.subr.bf16.mxu1 %v4318_v0 }
0x10d9   :  { %4023 = vmatpush3.bf16.msra.mxu1 %v4443_v10 }
0x10da   :  { %4030 = vmatprep.subr.bf16.mxu1 %v4318_v0 }
0x10dc   :  { %v1740_v33 = vpop.permute.xlu1 %1739 }
0x10dd   :  { %3733 = vmatmul.mubr.msk.f32.vlgmr.msra.gmra.mrb[18].mxu0 %vm181_vm3, %v1740_v33  ;;  %3744 = vmatmul.mubr.msk.f32.vlgmr.msra.gmra.mrb[18].mxu1 %vm181_vm3, %v1740_v33 }
0x10de   :  { %4026 = vmatpush3.bf16.msra.mxu0 %v4471_v31  ;;  %4032 = vmatpush3.bf16.msra.mxu1 %v4473_v35 }
0x10df   :  { %4027 = vmatprep.subr.bf16.mxu0 %v4318_v0  ;;  %3754 = vmatprep.mubr.msk.f32.mxu0 %vm4319_vm0, %v4320_v1 }
0x10e0   :  { %4033 = vmatprep.subr.bf16.mxu1 %v4318_v0  ;;  %3765 = vmatprep.mubr.msk.f32.mxu1 %vm4319_vm0, %v4320_v1 }
0x10e2   :  { %4029 = vmatpush3.bf16.msra.mxu0 %v4476_v38  ;;  %4035 = vmatpush3.bf16.msra.mxu1 %v4480_v39 }
0x10e3   :  { %4036 = vmatprep.subr.bf16.mxu0 %v4318_v0  ;;  %4042 = vmatprep.subr.bf16.mxu1 %v4318_v0 }
0x11a7   :  { %v1733_v34 = vpop.f32.mrb[16].mxu1 }
0x11a8   :  { %v3723_v36 = vpop.f32.mrb[17].mxu1 }
0x11b0   :  { %v1809_v37 = vpop.f32.mrb[18].mxu0  ;;  %v1907_v40 = vpop.f32.mrb[18].mxu1 }
0x11b1   :  { %v1810_v41 = vadd.f32 %v1809_v37, %v1733_v34  ;;  %v1912_v12 = vrot.slane %v1907_v40, 4  ;;  %v3734_v42 = vpop.f32.mrb[19].mxu0  ;;  %v3745_v43 = vpop.f32.mrb[19].mxu1 }
0x11b3   :  { %v1813_v44 = vadd.f32 %v4513_v46, %v1810_v41  ;;  %v1914_v45 = vadd.f32 %v4455_v11, %v1912_v12 }
0x11b5   :  { %4186 = vtanh.f32 %v1813_v44  ;;  %v1915_v47 = vadd.f32 %v4462_v13, %v1914_v45  ;;  %v1814_v50 = vmul.f32 0.5, %v1813_v44 }
0x11b7   :  { %4188 = vtanh.f32 %v1915_v47  ;;  %v1916_v51 = vmul.f32 0.5, %v1915_v47 }
0x11b8   :  { %4190 = vtanh.f32 %v1814_v50 }
0x11b9   :  { %4192 = vtanh.f32 %v1916_v51 }
0x11bf   :  { %v4187_v48 = vpop.eup %4186 }
0x11c0   :  { %1821 = vrot.lane.b32.xlu0 %v4187_v48, %s4321_s30 }
0x11c1   :  { %v4189_v49 = vpop.eup %4188 }
0x11c2   :  { %1926 = vrot.lane.b32.xlu1 %v4189_v49, %s4321_s30  ;;  %v4191_v52 = vpop.eup %4190 }
0x11c3   :  { %v4193_v53 = vpop.eup %4192  ;;  %v1816_v54 = vmul.f32 0.5, %v4191_v52 }
0x11c4   :  { %v1918_v55 = vmul.f32 0.5, %v4193_v53 }
0x11c5   :  { %v1817_v56 = vadd.f32 0.5, %v1816_v54 }
0x11c6   :  { %v1919_v59 = vadd.f32 0.5, %v1918_v55 }
0x11c7   :  { %v1819_v61 = vmul.f32 %v1817_v56, %v4686_v19 }
0x11c8   :  { %v1924_v3 = vmul.f32 %v1922_v62, %v1919_v59  ;;  %v2393_v62 = vld [vmem:[#allocation2] sm:$0xff] }
0x1232   :  { %v1822_v57 = vpop.permute.xlu0 %1821 }
0x1233   :  { %v1824_v58 = vmul.f32 %v1822_v57, %v1817_v56 }
0x1234   :  { %v1927_v13 = vpop.permute.xlu1 %1926 }
0x1235   :  { %1826 = vrot.lane.b32.xlu0 %v1824_v58, %s4322_s11  ;;  %v1929_v60 = vmul.f32 %v1927_v13, %v1919_v59 }
0x1237   :  { %1931 = vrot.lane.b32.xlu1 %v1929_v60, %s4322_s11 }
0x12a7   :  { %v1827_v63 = vpop.permute.xlu0 %1826 }
0x12a8   :  { %v4728_v2 = vadd.f32 %v1827_v63, %v1819_v61 }
0x12a9   :  { %v1932_v4 = vpop.permute.xlu1 %1931 }
0x12aa   :  { %4194 = vtanh.f32 %v4728_v2  ;;  %v4731_v6 = vadd.f32 %v1932_v4, %v1924_v3 }
0x12ac   :  { %4196 = vtanh.f32 %v4731_v6  ;;  %v2198_v51 = vrot.slane %v4731_v6, 6 }
0x12b4   :  { %v4195_v7 = vpop.eup %4194 }
0x12b5   :  { %1832 = vrot.lane.b32.xlu0 %v4195_v7, %s4321_s30 }
0x12b6   :  { %v4197_v8 = vpop.eup %4196 }
0x12b7   :  { %1937 = vrot.lane.b32.xlu1 %v4197_v8, %s4321_s30 }
0x1327   :  { %v1833_v9 = vpop.permute.xlu0 %1832 }
0x1328   :  { %v1835_v14 = vmul.f32 %v1833_v9, %v1817_v56  ;;  %v4804_v9 = vld [vmem:[%s4952_s6] ss:$0 sm:$0xff] }
0x1329   :  { %v1938_v15 = vpop.permute.xlu1 %1937 }
0x132a   :  { %1837 = vrot.lane.b32.xlu0 %v1835_v14, %s4322_s11  ;;  %v1940_v16 = vmul.f32 %v1938_v15, %v1919_v59 }
0x132c   :  { %v2014_v17 = vrot.slane %v1940_v16, 4 }
0x132e   :  { %2015 = vrot.lane.b32.xlu1 %v2014_v17, %s4322_s11 }
0x139c   :  { %v1838_v18 = vpop.permute.xlu0 %1837 }
0x139d   :  { %1840 = vst.msk [vmem:[#allocation2 + $0xa] sm:$0x3] %vm463_vm4, %v1838_v18  ;;  %3755 = vmatmul.mubr.msk.f32.vlgmr.msra.gmra.mrb[20].mxu0 %vm181_vm3, %v1838_v18 }
0x139e   :  { %4038 = vmatpush3.bf16.msra.mxu0 %v4431_v5  ;;  %3776 = vmatprep.mubr.msk.f32.mxu0 %vm4319_vm0, %v4320_v1 }
0x139f   :  { %4039 = vmatprep.subr.bf16.mxu0 %v4318_v0 }
0x13a0   :  { %v2016_v19 = vpop.permute.xlu1 %2015 }
0x13a1   :  { %3766 = vmatmul.mubr.msk.f32.vlgmr.msra.gmra.mrb[20].mxu1 %vm181_vm3, %v2016_v19 }
0x13a2   :  { %4041 = vmatpush3.bf16.msra.mxu0 %v4443_v10  ;;  %4044 = vmatpush3.bf16.msra.mxu1 %v4471_v31 }
0x13a3   :  { %4048 = vmatprep.subr.bf16.mxu0 %v4318_v0  ;;  %4045 = vmatprep.subr.bf16.mxu1 %v4318_v0 }
0x13a4   :  { %3787 = vmatprep.mubr.msk.f32.mxu1 %vm4319_vm0, %v4320_v1 }
0x13a5   :  { %3777 = vmatmul.mubr.msk.f32.vlgmr.msra.gmra.mrb[22].mxu0 %vm181_vm3, %v2016_v19 }
0x13a6   :  { %4050 = vmatpush3.bf16.msra.mxu0 %v4473_v35  ;;  %3798 = vmatprep.mubr.msk.f32.mxu0 %vm4319_vm0, %v4320_v1 }
0x13a7   :  { %4047 = vmatpush3.bf16.msra.mxu1 %v4476_v38  ;;  %4051 = vmatprep.subr.bf16.mxu0 %v4318_v0 }
0x13aa   :  { %4053 = vmatpush3.bf16.msra.mxu0 %v4480_v39 }
0x13ab   :  { %4062 = vmatprep.subr.bf16.mxu0 %v4318_v0 }
0x1470   :  { %v2009_v20 = vpop.f32.mrb[20].mxu0 }
0x1471   :  { %v3756_v21 = vpop.f32.mrb[21].mxu0 }
0x1474   :  { %v2085_v22 = vpop.f32.mrb[20].mxu1 }
0x1475   :  { %v2086_v23 = vadd.f32 %v2085_v22, %v2009_v20  ;;  %v3767_v24 = vpop.f32.mrb[21].mxu1 }
0x1477   :  { %v2089_v25 = vadd.f32 %v4513_v46, %v2086_v23 }
0x1478   :  { %v2183_v26 = vpop.f32.mrb[22].mxu0 }
0x1479   :  { %v2188_v27 = vrot.slane %v2183_v26, 2  ;;  %v3778_v28 = vpop.f32.mrb[23].mxu0  ;;  %4198 = vtanh.f32 %v2089_v25  ;;  %v2090_v46 = vmul.f32 0.5, %v2089_v25 }
0x147a   :  { %v88_v28 = vld [vmem:[%s4953_s7] sm:$0xff] }
0x147b   :  { %v2190_v29 = vadd.f32 %v4455_v11, %v2188_v27 }
0x147d   :  { %v2191_v32 = vadd.f32 %v4764_v30, %v2190_v29  ;;  %v89_v29 = vld [vmem:[%s4953_s7 + $0x8] sm:$0xff] }
0x147f   :  { %4200 = vtanh.f32 %v2191_v32  ;;  %v2192_v36 = vmul.f32 0.5, %v2191_v32  ;;  %v4819_v32 = vpack.c.bf16 %v89_v29, %v88_v28 }
0x1480   :  { %4202 = vtanh.f32 %v2090_v46 }
0x1481   :  { %4204 = vtanh.f32 %v2192_v36  ;;  %4055 = vmatprep.subr.bf16.mxu1 %v4819_v32 }
0x1483   :  { %v4199_v33 = vpop.eup %4198 }
0x1484   :  { %2097 = vrot.lane.b32.xlu1 %v4199_v33, %s4321_s30  ;;  %v90_v33 = vld [vmem:[%s4953_s7 + $0x10] sm:$0xff] }
0x1489   :  { %v4201_v34 = vpop.eup %4200 }
0x148a   :  { %2202 = vrot.lane.b32.xlu0 %v4201_v34, %s4321_s30  ;;  %v4203_v37 = vpop.eup %4202  ;;  %v91_v34 = vld [vmem:[%s4953_s7 + $0x18] sm:$0xff] }
0x148b   :  { %v2092_v11 = vmul.f32 0.5, %v4203_v37  ;;  %v4205_v40 = vpop.eup %4204  ;;  %v4828_v46 = vpack.c.bf16 %v91_v34, %v90_v33 }
0x148c   :  { %v2194_v42 = vmul.f32 0.5, %v4205_v40 }
0x148d   :  { %v2093_v41 = vadd.f32 0.5, %v2092_v11 }
0x148e   :  { %v2195_v44 = vadd.f32 0.5, %v2194_v42 }
0x148f   :  { %v2095_v48 = vmul.f32 %v2093_v41, %v4728_v2  ;;  %v4794_v2 = vld [vmem:[%s4947_s1] sm:$0xf] }
0x1490   :  { %v2200_v52 = vmul.f32 %v2198_v51, %v2195_v44 }
0x14f6   :  { %v2098_v12 = vpop.permute.xlu1 %2097 }
0x14f7   :  { %v2100_v43 = vmul.f32 %v2098_v12, %v2093_v41 }
0x14f9   :  { %2102 = vrot.lane.b32.xlu1 %v2100_v43, %s4322_s11 }
0x14fc   :  { %v2203_v45 = vpop.permute.xlu0 %2202 }
0x14fd   :  { %v2205_v47 = vmul.f32 %v2203_v45, %v2195_v44 }
0x14ff   :  { %2207 = vrot.lane.b32.xlu0 %v2205_v47, %s4322_s11 }
0x156b   :  { %v2103_v49 = vpop.permute.xlu1 %2102 }
0x156c   :  { %v2105_v50 = vadd.f32 %v2103_v49, %v2095_v48 }
0x156e   :  { %4206 = vtanh.f32 %v2105_v50 }
0x1571   :  { %v2208_v53 = vpop.permute.xlu0 %2207 }
0x1572   :  { %v4773_v54 = vadd.f32 %v2208_v53, %v2200_v52 }
0x1574   :  { %4208 = vtanh.f32 %v4773_v54 }
0x1578   :  { %v4207_v55 = vpop.eup %4206 }
0x1579   :  { %2108 = vrot.lane.b32.xlu1 %v4207_v55, %s4321_s30 }
0x157e   :  { %v4209_v56 = vpop.eup %4208 }
0x157f   :  { %2213 = vrot.lane.b32.xlu0 %v4209_v56, %s4321_s30 }
0x15eb   :  { %v2109_v57 = vpop.permute.xlu1 %2108 }
0x15ec   :  { %v2111_v58 = vmul.f32 %v2109_v57, %v2093_v41  ;;  %v4846_v41 = vld [vmem:[%s4954_s8] ss:$0 sm:$0xff] }
0x15ee   :  { %2113 = vrot.lane.b32.xlu0 %v2111_v58, %s4322_s11 }
0x15f1   :  { %v2214_v59 = vpop.permute.xlu0 %2213 }
0x15f2   :  { %v2216_v13 = vmul.f32 %v2214_v59, %v2195_v44 }
0x15f4   :  { %v2290_v60 = vrot.slane %v2216_v13, 6 }
0x15f6   :  { %2291 = vrot.lane.b32.xlu1 %v2290_v60, %s4322_s11  ;;  %v2635_v60 = vrot.slane %v4773_v54, 6 }
0x1660   :  { %v2114_v61 = vpop.permute.xlu0 %2113 }
0x1661   :  { %2116 = vst.msk [vmem:[#allocation2 + $0xc] sm:$0x3] %vm463_vm4, %v2114_v61  ;;  %3788 = vmatmul.mubr.msk.f32.vlgmr.msra.gmra.mrb[22].mxu1 %vm181_vm3, %v2114_v61 }
0x1662   :  { %3809 = vmatprep.mubr.msk.f32.mxu1 %vm181_vm3, %v2393_v62  ;;  %4057 = vmatpush3.bf16.msra.mxu1 %v4819_v32 }
0x1663   :  { %4059 = vmatprep.subr.bf16.mxu1 %v4828_v46 }
0x1666   :  { %4061 = vmatpush3.bf16.msra.mxu1 %v4828_v46 }
0x1667   :  { %4074 = vmatprep.subr.bf16.mxu1 %v4318_v0 }
0x1668   :  { %v2292_v63 = vpop.permute.xlu1 %2291 }
0x1669   :  { %3799 = vmatmul.mubr.msk.f32.vlgmr.msra.gmra.mrb[24].mxu0 %vm181_vm3, %v2292_v63 }
0x166a   :  { %4064 = vmatpush3.bf16.msra.mxu0 %v4431_v5  ;;  %3820 = vmatprep.mubr.msk.f32.mxu0 %vm4319_vm0, %v4320_v1 }
0x166b   :  { %4065 = vmatprep.subr.bf16.mxu0 %v4318_v0 }
0x166e   :  { %4067 = vmatpush3.bf16.msra.mxu0 %v4443_v10 }
0x166f   :  { %3823 = vmatprep.subr.mxu0 %v4320_v1 }
0x1671   :  { %3821 = vmatmul.mubr.msk.f32.vlgmr.msra.gmra.mrb[26].mxu0 %vm181_vm3, %v2292_v63 }
0x1672   :  { %3824 = vmatpush3.msk.msra.mxu0 %vm102_vm1, %v4794_v2  ;;  %3825 = vmatprep.mubr.msk.f32.mxu0 %vm4319_vm0, %v4320_v1 }
0x1673   :  { %4068 = vmatprep.subr.bf16.mxu0 %v4318_v0 }
0x1734   :  { %v2285_v3 = vpop.f32.mrb[22].mxu1 }
0x1735   :  { %v3789_v4 = vpop.f32.mrb[23].mxu1 }
0x173c   :  { %v2361_v6 = vpop.f32.mrb[24].mxu0 }
0x173d   :  { %v2362_v7 = vadd.f32 %v2361_v6, %v2285_v3  ;;  %v3800_v8 = vpop.f32.mrb[25].mxu0 }
0x173f   :  { %v2365_v14 = vadd.f32 %v4804_v9, %v2362_v7 }
0x1741   :  { %4210 = vtanh.f32 %v2365_v14  ;;  %v2366_v18 = vmul.f32 0.5, %v2365_v14 }
0x1743   :  { %4212 = vtanh.f32 %v2366_v18 }
0x1744   :  { %v2550_v15 = vpop.f32.mrb[26].mxu0 }
0x1745   :  { %v3822_v16 = vpop.f32.mrb[27].mxu0 }
0x174b   :  { %v4211_v17 = vpop.eup %4210 }
0x174c   :  { %2373 = vrot.lane.b32.xlu0 %v4211_v17, %s4321_s30 }
0x174d   :  { %v4213_v19 = vpop.eup %4212 }
0x174e   :  { %v2368_v20 = vmul.f32 0.5, %v4213_v19 }
0x1750   :  { %v2369_v21 = vadd.f32 0.5, %v2368_v20 }
0x1752   :  { %v2371_v24 = vmul.f32 %v2369_v21, %v2105_v50 }
0x17be   :  { %v2374_v22 = vpop.permute.xlu0 %2373 }
0x17bf   :  { %v2376_v23 = vmul.f32 %v2374_v22, %v2369_v21 }
0x17c1   :  { %2378 = vrot.lane.b32.xlu1 %v2376_v23, %s4322_s11 }
0x1833   :  { %v2379_v25 = vpop.permute.xlu1 %2378 }
0x1834   :  { %v4809_v26 = vadd.f32 %v2379_v25, %v2371_v24 }
0x1836   :  { %4214 = vtanh.f32 %v4809_v26 }
0x1840   :  { %v4215_v27 = vpop.eup %4214 }
0x1841   :  { %2384 = vrot.lane.b32.xlu0 %v4215_v27, %s4321_s30 }
0x18b3   :  { %v2385_v36 = vpop.permute.xlu0 %2384 }
0x18b4   :  { %v2387_v37 = vmul.f32 %v2385_v36, %v2369_v21 }
0x18b6   :  { %2389 = vrot.lane.b32.xlu1 %v2387_v37, %s4322_s11 }
0x1928   :  { %v2390_v11 = vpop.permute.xlu1 %2389 }
0x1929   :  { %2392 = vst.msk [vmem:[#allocation2 + $0xe] sm:$0x3] %vm463_vm4, %v2390_v11 }
0x1930   :  { %v2394_v40 = vld [vmem:[#allocation2 + $0x8] sm:$0xff] }
0x1931   :  { %3810 = vmatmul.mubr.msk.f32.vlgmr.msra.gmra.mrb[24].mxu1 %vm181_vm3, %v2394_v40 }
0x1932   :  { %4076 = vmatpush3.bf16.msra.mxu1 %v4473_v35  ;;  %3847 = vmatprep.mubr.msk.f32.mxu1 %vm4319_vm0, %v4320_v1 }
0x1933   :  { %4077 = vmatprep.subr.bf16.mxu1 %v4318_v0 }
0x1936   :  { %4079 = vmatpush3.bf16.msra.mxu1 %v4480_v39 }
0x1937   :  { %4086 = vmatprep.subr.bf16.mxu1 %v4318_v0 }
0x1a04   :  { %v3811_v12 = vpop.f32.mrb[24].mxu1 }
0x1a05   :  { %v2479_v42 = vadd.f32 %v3811_v12, %v4846_v41  ;;  %v2473_v43 = vpop.f32.mrb[25].mxu1 }
0x1a06   :  { %v2474_v44 = vadd.f32 %v4846_v41, %v2473_v43 }
0x1a07   :  { %2483 = vst.msk [vmem:[%s4955_s9 + $0x8] sm:$0xff] %vm95_vm2, %v2479_v42  ;;  %v2555_v45 = vrot.slane %v2479_v42, 4 }
0x1a08   :  { %2482 = vst.msk [vmem:[%s4955_s9] sm:$0xff] %vm95_vm2, %v2474_v44 }
0x1a09   :  { %3826 = vmatmul.mubr.msk.f32.vlgmr.msra.gmra.mrb[28].mxu0 %vm95_vm2, %v2555_v45 }
0x1a0a   :  { %4070 = vmatpush3.bf16.msra.mxu0 %v4471_v31  ;;  %3836 = vmatprep.mubr.msk.f32.mxu0 %vm4319_vm0, %v4320_v1 }
0x1a0b   :  { %4071 = vmatprep.subr.bf16.mxu0 %v4318_v0 }
0x1a0e   :  { %4073 = vmatpush3.bf16.msra.mxu0 %v4476_v38 }
0x1a0f   :  { %4080 = vmatprep.subr.bf16.mxu0 %v4318_v0 }
0x1a11   :  { %3837 = vmatmul.mubr.msk.f32.vlgmr.msra.gmra.mrb[30].mxu0 %vm181_vm3, %v2390_v11 }
0x1a12   :  { %4082 = vmatpush3.bf16.msra.mxu0 %v4819_v32  ;;  %3858 = vmatprep.mubr.msk.f32.mxu0 %vm4319_vm0, %v4320_v1 }
0x1a13   :  { %4083 = vmatprep.subr.bf16.mxu0 %v4318_v0 }
0x1a16   :  { %4085 = vmatpush3.bf16.msra.mxu0 %v4828_v46 }
0x1a17   :  { %3872 = vmatprep.subr.mxu0 %v4320_v1 }
0x1adc   :  { %v2624_v47 = vpop.f32.mrb[28].mxu0 }
0x1add   :  { %v2625_v48 = vadd.f32 %v2624_v47, %v2550_v15  ;;  %v3827_v49 = vpop.f32.mrb[29].mxu0 }
0x1adf   :  { %v2628_v50 = vadd.f32 %v4764_v30, %v2625_v48 }
0x1ae1   :  { %4216 = vtanh.f32 %v2628_v50  ;;  %v2629_v55 = vmul.f32 0.5, %v2628_v50 }
0x1ae3   :  { %4218 = vtanh.f32 %v2629_v55 }
0x1ae4   :  { %v2722_v51 = vpop.f32.mrb[30].mxu0 }
0x1ae5   :  { %v3838_v52 = vpop.f32.mrb[31].mxu0 }
0x1aeb   :  { %v4217_v53 = vpop.eup %4216 }
0x1aec   :  { %2639 = vrot.lane.b32.xlu0 %v4217_v53, %s4321_s30 }
0x1aed   :  { %v4219_v56 = vpop.eup %4218 }
0x1aee   :  { %v2631_v57 = vmul.f32 0.5, %v4219_v56 }
0x1af0   :  { %v2632_v58 = vadd.f32 0.5, %v2631_v57 }
0x1af2   :  { %v2637_v61 = vmul.f32 %v2635_v60, %v2632_v58 }
0x1b5e   :  { %v2640_v59 = vpop.permute.xlu0 %2639 }
0x1b5f   :  { %v2642_v13 = vmul.f32 %v2640_v59, %v2632_v58 }
0x1b61   :  { %2644 = vrot.lane.b32.xlu1 %v2642_v13, %s4322_s11 }
0x1bd3   :  { %v2645_v62 = vpop.permute.xlu1 %2644 }
0x1bd4   :  { %v4876_v63 = vadd.f32 %v2645_v62, %v2637_v61 }
0x1bd6   :  { %4220 = vtanh.f32 %v4876_v63 }
0x1be0   :  { %v4221_v3 = vpop.eup %4220 }
0x1be1   :  { %2650 = vrot.lane.b32.xlu0 %v4221_v3, %s4321_s30 }
0x1c53   :  { %v2651_v4 = vpop.permute.xlu0 %2650 }
0x1c54   :  { %v2653_v6 = vmul.f32 %v2651_v4, %v2632_v58 }
0x1c56   :  { %2727 = vrot.lane.b32.xlu1 %v2653_v6, %s4322_s11 }
0x1cc8   :  { %v2728_v7 = vpop.permute.xlu1 %2727 }
0x1cc9   :  { %3848 = vmatmul.mubr.msk.f32.vlgmr.msra.gmra.mrb[26].mxu1 %vm181_vm3, %v2728_v7 }
0x1cca   :  { %4088 = vmatpush3.bf16.msra.mxu1 %v4431_v5  ;;  %3869 = vmatprep.mubr.msk.f32.mxu1 %vm4319_vm0, %v4320_v1 }
0x1ccb   :  { %4089 = vmatprep.subr.bf16.mxu1 %v4318_v0 }
0x1cce   :  { %4091 = vmatpush3.bf16.msra.mxu1 %v4443_v10 }
0x1ccf   :  { %4092 = vmatprep.subr.bf16.mxu1 %v4318_v0 }
0x1cd1   :  { %3870 = vmatmul.mubr.msk.f32.vlgmr.msra.gmra.mrb[28].mxu1 %vm181_vm3, %v2728_v7 }
0x1cd2   :  { %4094 = vmatpush3.bf16.msra.mxu1 %v4471_v31  ;;  %3885 = vmatprep.mubr.msk.f32.mxu1 %vm4319_vm0, %v4320_v1 }
0x1cd3   :  { %4095 = vmatprep.subr.bf16.mxu1 %v4318_v0 }
0x1cd6   :  { %4097 = vmatpush3.bf16.msra.mxu1 %v4476_v38 }
0x1cd7   :  { %4104 = vmatprep.subr.bf16.mxu1 %v4318_v0 }
0x1d9c   :  { %v2797_v5 = vpop.f32.mrb[26].mxu1 }
0x1d9d   :  { %v2798_v54 = vadd.f32 %v2797_v5, %v2722_v51  ;;  %v3849_v8 = vpop.f32.mrb[27].mxu1 }
0x1d9f   :  { %v2801_v10 = vadd.f32 %v4804_v9, %v2798_v54 }
0x1da1   :  { %4222 = vtanh.f32 %v2801_v10  ;;  %v2802_v31 = vmul.f32 0.5, %v2801_v10 }
0x1da3   :  { %4224 = vtanh.f32 %v2802_v31 }
0x1da4   :  { %v2967_v14 = vpop.f32.mrb[28].mxu1 }
0x1da5   :  { %v3871_v15 = vpop.f32.mrb[29].mxu1 }
0x1dab   :  { %v4223_v16 = vpop.eup %4222 }
0x1dac   :  { %2809 = vrot.lane.b32.xlu0 %v4223_v16, %s4321_s30 }
0x1dad   :  { %v4225_v17 = vpop.eup %4224 }
0x1dae   :  { %v2804_v18 = vmul.f32 0.5, %v4225_v17 }
0x1db0   :  { %v2805_v19 = vadd.f32 0.5, %v2804_v18 }
0x1db2   :  { %v2807_v21 = vmul.f32 %v2805_v19, %v4809_v26 }
0x1e1e   :  { %v2810_v20 = vpop.permute.xlu0 %2809 }
0x1e1f   :  { %v2812_v38 = vmul.f32 %v2810_v20, %v2805_v19 }
0x1e21   :  { %2814 = vrot.lane.b32.xlu1 %v2812_v38, %s4322_s11 }
0x1e93   :  { %v2815_v22 = vpop.permute.xlu1 %2814 }
0x1e94   :  { %v4899_v23 = vadd.f32 %v2815_v22, %v2807_v21 }
0x1e96   :  { %4226 = vtanh.f32 %v4899_v23 }
0x1ea0   :  { %v4227_v24 = vpop.eup %4226 }
0x1ea1   :  { %2820 = vrot.lane.b32.xlu0 %v4227_v24, %s4321_s30 }
0x1f13   :  { %v2821_v25 = vpop.permute.xlu0 %2820 }
0x1f14   :  { %v2823_v27 = vmul.f32 %v2821_v25, %v2805_v19 }
0x1f16   :  { %2825 = vrot.lane.b32.xlu1 %v2823_v27, %s4322_s11 }
0x1f88   :  { %v2826_v28 = vpop.permute.xlu1 %2825 }
0x1f89   :  { %3859 = vmatmul.mubr.msk.f32.vlgmr.msra.gmra.mrb[32].mxu0 %vm181_vm3, %v2826_v28  ;;  %3886 = vmatmul.mubr.msk.f32.vlgmr.msra.gmra.mrb[30].mxu1 %vm181_vm3, %v2826_v28 }
0x1f8a   :  { %3873 = vmatpush3.msk.msra.mxu0 %vm102_vm1, %v4794_v2  ;;  %3874 = vmatprep.mubr.msk.f32.mxu0 %vm4319_vm0, %v4320_v1 }
0x1f8b   :  { %4098 = vmatprep.subr.bf16.mxu0 %v4318_v0  ;;  %4106 = vmatpush3.bf16.msra.mxu1 %v4819_v32 }
0x1f8c   :  { %4107 = vmatprep.subr.bf16.mxu1 %v4318_v0  ;;  %3907 = vmatprep.mubr.msk.f32.mxu1 %vm4319_vm0, %v4320_v1 }
0x1f8f   :  { %4109 = vmatpush3.bf16.msra.mxu1 %v4828_v46 }
0x205c   :  { %v2895_v26 = vpop.f32.mrb[32].mxu0  ;;  %v3133_v29 = vpop.f32.mrb[30].mxu1 }
0x205d   :  { %v2896_v33 = vadd.f32 %v4846_v41, %v2895_v26  ;;  %v3860_v2 = vpop.f32.mrb[33].mxu0  ;;  %v3887_v34 = vpop.f32.mrb[31].mxu1 }
0x205f   :  { %2900 = vst.msk [vmem:[%s4955_s9 + $0x10] sm:$0x3] %vm2899_vm5, %v2896_v33  ;;  %3875 = vmatmul.mubr.msk.f32.vlgmr.msra.gmra.mrb[34].mxu0 %vm95_vm2, %v2896_v33 }
0x2060   :  { %4100 = vmatpush3.bf16.msra.mxu0 %v4473_v35  ;;  %3896 = vmatprep.mubr.msk.f32.mxu0 %vm4319_vm0, %v4320_v1 }
0x2061   :  { %4101 = vmatprep.subr.bf16.mxu0 %v4318_v0 }
0x2064   :  { %4103 = vmatpush3.bf16.msra.mxu0 %v4480_v39 }
0x2132   :  { %v3040_v32 = vpop.f32.mrb[34].mxu0 }
0x2133   :  { %v3041_v46 = vadd.f32 %v3040_v32, %v2967_v14  ;;  %v3876_v36 = vpop.f32.mrb[35].mxu0 }
0x2135   :  { %v3044_v37 = vadd.f32 %v4764_v30, %v3041_v46 }
0x2137   :  { %4228 = vtanh.f32 %v3044_v37  ;;  %v3045_v40 = vmul.f32 0.5, %v3044_v37 }
0x2139   :  { %4230 = vtanh.f32 %v3045_v40 }
0x2141   :  { %v4229_v11 = vpop.eup %4228 }
0x2142   :  { %3052 = vrot.lane.b32.xlu0 %v4229_v11, %s4321_s30 }
0x2143   :  { %v4231_v12 = vpop.eup %4230 }
0x2144   :  { %v3047_v35 = vmul.f32 0.5, %v4231_v12 }
0x2146   :  { %v3048_v42 = vadd.f32 0.5, %v3047_v35 }
0x2148   :  { %v3050_v0 = vmul.f32 %v3048_v42, %v4876_v63 }
0x21b4   :  { %v3053_v43 = vpop.permute.xlu0 %3052 }
0x21b5   :  { %v3055_v1 = vmul.f32 %v3053_v43, %v3048_v42 }
0x21b7   :  { %3057 = vrot.lane.b32.xlu1 %v3055_v1, %s4322_s11 }
0x2229   :  { %v3058_v39 = vpop.permute.xlu1 %3057 }
0x222a   :  { %v3060_v44 = vadd.f32 %v3058_v39, %v3050_v0 }
0x222c   :  { %4232 = vtanh.f32 %v3060_v44 }
0x2236   :  { %v4233_v45 = vpop.eup %4232 }
0x2237   :  { %3063 = vrot.lane.b32.xlu0 %v4233_v45, %s4321_s30 }
0x22a9   :  { %v3064_v30 = vpop.permute.xlu0 %3063 }
0x22aa   :  { %v3066_v47 = vmul.f32 %v3064_v30, %v3048_v42 }
0x22ac   :  { %3138 = vrot.lane.b32.xlu1 %v3066_v47, %s4322_s11 }
0x231e   :  { %v3139_v48 = vpop.permute.xlu1 %3138 }
0x231f   :  { %3897 = vmatmul.mubr.msk.f32.vlgmr.msra.gmra.mrb[36].mxu0 %vm181_vm3, %v3139_v48 }
0x23f2   :  { %v3208_v49 = vpop.f32.mrb[36].mxu0 }
0x23f3   :  { %v3209_v50 = vadd.f32 %v3208_v49, %v3133_v29  ;;  %v3898_v51 = vpop.f32.mrb[37].mxu0 }
0x23f5   :  { %v3212_v52 = vadd.f32 %v4804_v9, %v3209_v50 }
0x23f7   :  { %4234 = vtanh.f32 %v3212_v52  ;;  %v3213_v55 = vmul.f32 0.5, %v3212_v52 }
0x23f9   :  { %4236 = vtanh.f32 %v3213_v55 }
0x2401   :  { %v4235_v53 = vpop.eup %4234 }
0x2402   :  { %3220 = vrot.lane.b32.xlu0 %v4235_v53, %s4321_s30 }
0x2403   :  { %v4237_v56 = vpop.eup %4236 }
0x2404   :  { %v3215_v57 = vmul.f32 0.5, %v4237_v56 }
0x2406   :  { %v3216_v58 = vadd.f32 0.5, %v3215_v57 }
0x2408   :  { %v3218_v60 = vmul.f32 %v3216_v58, %v4899_v23 }
0x2474   :  { %v3221_v59 = vpop.permute.xlu0 %3220 }
0x2475   :  { %v3223_v13 = vmul.f32 %v3221_v59, %v3216_v58 }
0x2477   :  { %3225 = vrot.lane.b32.xlu1 %v3223_v13, %s4322_s11 }
0x24e9   :  { %v3226_v61 = vpop.permute.xlu1 %3225 }
0x24ea   :  { %v3228_v62 = vadd.f32 %v3226_v61, %v3218_v60 }
0x24ec   :  { %4238 = vtanh.f32 %v3228_v62 }
0x24f6   :  { %v4239_v63 = vpop.eup %4238 }
0x24f7   :  { %3231 = vrot.lane.b32.xlu0 %v4239_v63, %s4321_s30 }
0x2569   :  { %v3232_v9 = vpop.permute.xlu0 %3231 }
0x256a   :  { %v3234_v3 = vmul.f32 %v3232_v9, %v3216_v58 }
0x256c   :  { %3236 = vrot.lane.b32.xlu1 %v3234_v3, %s4322_s11 }
0x25de   :  { %v3237_v4 = vpop.permute.xlu1 %3236 }
0x25df   :  { %3908 = vmatmul.mubr.msk.f32.vlgmr.msra.gmra.mrb[32].mxu1 %vm181_vm3, %v3237_v4 }
0x26b2   :  { %v3306_v6 = vpop.f32.mrb[32].mxu1 }
0x26b3   :  { %v3307_v7 = vadd.f32 %v4846_v41, %v3306_v6  ;;  %v3909_v5 = vpop.f32.mrb[33].mxu1 }
0x26b5   :  { %3310 = vst.msk [vmem:[%s4955_s9 + $0x12] sm:$0x3] %vm2899_vm5, %v3307_v7 }
0x26b6   :  { %3315 = vsyncpa [#allocation4], 1 }
0x26b7   :  { %3316 = vsyncpa [#allocation6], 1 }

</bundles_post_ra>
